<compile_context>
chip_gen: v7x
topology: tpu7x:2x2x1
jax: 0.10.0
libtpu: 0.0.40
codegen_flags: <defaults>
</compile_context>

<pallas_src>
import functools

import jax
import jax.numpy as jnp
from jax.experimental import pallas as pl
from jax.experimental.pallas import tpu as pltpu

LANE = 128


def _round_up(x, m):
    return (x + m - 1) // m * m


def _pick_spatial_chunk(hw, max_chunk=128):
    """Largest multiple-of-8 divisor of H*W up to max_chunk (else full extent)."""
    if hw % 8 != 0:
        return hw
    best = 8
    for t in range(8, min(hw, max_chunk) + 1, 8):
        if hw % t == 0:
            best = t
    return best


# ------------------------------ fused Pallas kernel ------------------------------ #

def _fused_forward_kernel(cols_ref, cw_ref, cb_ref, pw_ref, pb_ref, fw_ref,
                          fb_ref, o_ref, pool_ref, *, inv_hw):
    """Grid = (batch tiles [parallel], spatial chunks [arbitrary]).

    Per step: conv as ONE K=Kpad matmul on the im2col chunk, +bias, ReLU, and
    accumulate the pooled sum into `pool_ref`.  On the last spatial step:
    mean, Linear(hidden->512)+ReLU, Linear(512->numclass), store lane-dense logits.
    """
    j = pl.program_id(1)
    tb, t_hw, kpad = cols_ref.shape
    cpad = cw_ref.shape[-1]

    @pl.when(j == 0)
    def _():
        pool_ref[...] = jnp.zeros_like(pool_ref)

    # im2col chunk [tb*t_hw, Kpad] (bf16) @ [Kpad, cpad] (bf16) -> f32 accumulate.
    lhs = cols_ref[...].reshape(tb * t_hw, kpad)
    conv = jnp.dot(lhs, cw_ref[...], preferred_element_type=jnp.float32)
    conv = jnp.maximum(conv + cb_ref[...], 0.0)                  # [tb*t_hw, cpad]

    # Streamed global-avg-pool: accumulate the spatial SUM (divide once at the end).
    pool_ref[...] += conv.reshape(tb, t_hw, cpad).sum(axis=1)

    @pl.when(j == pl.num_programs(1) - 1)
    def _():
        pooled = (pool_ref[...] * inv_hw).astype(pw_ref.dtype)   # [tb, cpad] bf16
        feat = jnp.dot(pooled, pw_ref[...], preferred_element_type=jnp.float32)
        feat = jnp.maximum(feat + pb_ref[...], 0.0).astype(fw_ref.dtype)
        logits = jnp.dot(feat, fw_ref[...], preferred_element_type=jnp.float32)
        o_ref[...] = (logits + fb_ref[...]).astype(o_ref.dtype)


# ------------------------------ wrapper / params --------------------------------- #

def network_forward(packed, x_nchw, *, numclass, tile_b=64, spatial_chunk=128):
    """Equivalent of network.forward: fc(feature(input)). Returns [B, numclass]."""
    B, C, H, W = x_nchw.shape
    HW = H * W
    kdim = 9 * C
    kpad = packed["conv_w"].shape[0]        # 9*Cin lane-padded to 128
    cpad = packed["conv_w"].shape[1]        # hidden channels padded to 128
    feat_dim = packed["proj_w"].shape[-1]   # 512
    npad = packed["fc_w"].shape[-1]         # numclass padded to 128
    in_dtype = packed["conv_w"].dtype

    # --- batch tiling: multiple of 8, keep >=2 parallel grid steps when possible ---
    b8 = _round_up(B, 8)
    tb = _round_up(min(tile_b, b8), 8)
    if b8 > 8 and tb >= b8:
        tb = _round_up(b8 // 2, 8)          # >=2 steps -> both v7x TensorCores busy
    Bp = _round_up(B, tb)

    t_hw = _pick_spatial_chunk(HW, spatial_chunk)

    # --- wrapper-side lane-dense im2col (tiny at these sizes; single XLA fusion) ---
    x_nhwc = jnp.transpose(x_nchw, (0, 2, 3, 1))
    xp = jnp.pad(x_nhwc, ((0, 0), (1, 1), (1, 1), (0, 0)))
    taps = [xp[:, kh:kh + H, kw:kw + W, :] for kh in range(3) for kw in range(3)]
    cols = jnp.concatenate(taps, axis=-1).reshape(B, HW, kdim)   # [B, H*W, 9*Cin]
    cols = jnp.pad(cols, ((0, Bp - B), (0, 0), (0, kpad - kdim))).astype(in_dtype)

    # --- VMEM budget (double-buffered input/output tiles + conv chunk + weights) ---
    isz = jnp.dtype(in_dtype).itemsize
    est = (2 * tb * t_hw * kpad * isz
           + tb * t_hw * cpad * 4
           + tb * cpad * 4
           + 2 * tb * npad * 4
           + (kpad * cpad + cpad * feat_dim + feat_dim * npad) * isz
           + (cpad + feat_dim + npad) * 4)
    vmem_limit = int(min(64 * 1024 * 1024, max(32 * 1024 * 1024, 2 * est)))

    kernel = functools.partial(_fused_forward_kernel, inv_hw=1.0 / float(HW))

    out = pl.pallas_call(
        kernel,
        out_shape=jax.ShapeDtypeStruct((Bp, npad), x_nchw.dtype),
        grid=(Bp // tb, HW // t_hw),
        in_specs=[
            pl.BlockSpec((tb, t_hw, kpad), lambda i, j: (i, j, 0)),  # im2col chunk
            pl.BlockSpec((kpad, cpad), lambda i, j: (0, 0)),         # conv weight
            pl.BlockSpec((1, cpad), lambda i, j: (0, 0)),            # conv bias
            pl.BlockSpec((cpad, feat_dim), lambda i, j: (0, 0)),     # proj weight
            pl.BlockSpec((1, feat_dim), lambda i, j: (0, 0)),        # proj bias
            pl.BlockSpec((feat_dim, npad), lambda i, j: (0, 0)),     # fc weight
            pl.BlockSpec((1, npad), lambda i, j: (0, 0)),            # fc bias
        ],
        out_specs=pl.BlockSpec((tb, npad), lambda i, j: (i, 0)),     # lane-dense out
        scratch_shapes=[pltpu.VMEM((tb, cpad), jnp.float32)],        # pooled-sum acc
        compiler_params=pltpu.CompilerParams(
            dimension_semantics=("parallel", "arbitrary"),
            vmem_limit_bytes=vmem_limit),
    )(cols, packed["conv_w"], packed["conv_b"], packed["proj_w"],
      packed["proj_b"], packed["fc_w"], packed["fc_b"])

    return out[:B, :numclass]


def init_params(key, cin, hidden_c, feat_dim, numclass):
    """PyTorch-layout parameters (conv [Cout,Cin,kh,kw], linears [out,in])."""
    k = jax.random.split(key, 6)
    scale = 0.05
    return {
        "conv_w": scale * jax.random.normal(k[0], (hidden_c, cin, 3, 3), jnp.float32),
        "conv_b": scale * jax.random.normal(k[1], (hidden_c,), jnp.float32),
        "proj_w": scale * jax.random.normal(k[2], (feat_dim, hidden_c), jnp.float32),
        "proj_b": scale * jax.random.normal(k[3], (feat_dim,), jnp.float32),
        "fc_w": scale * jax.random.normal(k[4], (numclass, feat_dim), jnp.float32),
        "fc_b": scale * jax.random.normal(k[5], (numclass,), jnp.float32),
    }


def pack_params(params, numclass, *, compute_dtype=jnp.bfloat16):
    """One-time repack: im2col weight [9*Cin, Cout], [in,out] linears, lane-pad to 128,
    bf16 matmul operands (f32 biases / accumulation)."""
    cout, cin, kh, kw = params["conv_w"].shape
    feat_dim = params["proj_w"].shape[0]
    kdim = kh * kw * cin
    kpad = _round_up(kdim, LANE)
    cpad = _round_up(cout, LANE)
    npad = _round_up(numclass, LANE)

    cw = jnp.transpose(params["conv_w"], (2, 3, 1, 0)).reshape(kdim, cout)
    cw = jnp.pad(cw, ((0, kpad - kdim), (0, cpad - cout))).astype(compute_dtype)
    cb = jnp.pad(params["conv_b"], (0, cpad - cout)).reshape(1, cpad).astype(jnp.float32)
    pw = jnp.pad(params["proj_w"].T, ((0, cpad - cout), (0, 0))).astype(compute_dtype)
    pb = params["proj_b"].reshape(1, feat_dim).astype(jnp.float32)
    fw = jnp.pad(params["fc_w"].T, ((0, 0), (0, npad - numclass))).astype(compute_dtype)
    fb = jnp.pad(params["fc_b"], (0, npad - numclass)).reshape(1, npad).astype(jnp.float32)
    return {"conv_w": cw, "conv_b": cb, "proj_w": pw, "proj_b": pb,
            "fc_w": fw, "fc_b": fb}


# --------------------------- pure-JAX reference (check) -------------------------- #

def reference_forward(params, x_nchw):
    hi = jax.lax.Precision.HIGHEST
    y = jax.lax.conv_general_dilated(
        x_nchw, params["conv_w"], window_strides=(1, 1), padding="SAME",
        dimension_numbers=("NCHW", "OIHW", "NCHW"), precision=hi)
    y = jnp.maximum(y + params["conv_b"][None, :, None, None], 0.0)
    pooled = jnp.mean(y, axis=(2, 3))                                   # [B, hidden]
    feat = jnp.maximum(
        jnp.dot(pooled, params["proj_w"].T, precision=hi) + params["proj_b"], 0.0)
    return jnp.dot(feat, params["fc_w"].T, precision=hi) + params["fc_b"]


# ----------------------------------- main ----------------------------------------- #

if __name__ == "__main__":
    B, Cin, H, W = 16, 4, 16, 16
    hidden_c, feat_dim, numclass = 32, 512, 10

    key = jax.random.PRNGKey(0)
    kx, kp = jax.random.split(key)
    x = jax.random.normal(kx, (B, Cin, H, W), jnp.float32)      # NCHW like PyTorch
    params = init_params(kp, Cin, hidden_c, feat_dim, numclass)
    packed = pack_params(params, numclass)                      # one-time repack

    fwd = jax.jit(functools.partial(network_forward, numclass=numclass))
    out = jax.block_until_ready(fwd(packed, x))
    assert out.shape == (B, numclass), out.shape

    ref = reference_forward(params, x)
    err = float(jnp.max(jnp.abs(out - ref)))
    # bf16 matmul operands with f32 accumulation vs f32 HIGHEST reference.
    assert err < 2e-2, f"max abs err vs reference: {err}"
    print("KERNEL_OK")
</pallas_src>

<mosaic_0001>
module attributes {stable_mosaic.version = 11 : i64} {
  func.func @_fused_forward_kernel(%arg0: i32, %arg1: i32, %arg2: memref<8x128x128xbf16, #tpu.memory_space<vmem>>, %arg3: memref<128x128xbf16, #tpu.memory_space<vmem>>, %arg4: memref<1x128xf32, #tpu.memory_space<vmem>>, %arg5: memref<128x512xbf16, #tpu.memory_space<vmem>>, %arg6: memref<1x512xf32, #tpu.memory_space<vmem>>, %arg7: memref<512x128xbf16, #tpu.memory_space<vmem>>, %arg8: memref<1x128xf32, #tpu.memory_space<vmem>>, %arg9: memref<8x128xf32, #tpu.memory_space<vmem>>, %arg10: memref<8x128xf32, #tpu.memory_space<vmem>>) attributes {dimension_semantics = [#tpu.dimension_semantics<parallel>, #tpu.dimension_semantics<arbitrary>], iteration_bounds = array<i64: 2, 2>, scalar_prefetch = 0 : i64, scratch_operands = 1 : i64, tpu.core_type = #tpu.core_type<tc>, window_params = [{transform_indices = @transform_0, window_bounds = array<i64: 8, 128, 128>}, {pipeline_mode = #tpu.pipeline_mode<synchronous>, transform_indices = @transform_1, window_bounds = array<i64: 128, 128>}, {pipeline_mode = #tpu.pipeline_mode<synchronous>, transform_indices = @transform_2, window_bounds = array<i64: 1, 128>}, {pipeline_mode = #tpu.pipeline_mode<synchronous>, transform_indices = @transform_3, window_bounds = array<i64: 128, 512>}, {pipeline_mode = #tpu.pipeline_mode<synchronous>, transform_indices = @transform_4, window_bounds = array<i64: 1, 512>}, {pipeline_mode = #tpu.pipeline_mode<synchronous>, transform_indices = @transform_5, window_bounds = array<i64: 512, 128>}, {pipeline_mode = #tpu.pipeline_mode<synchronous>, transform_indices = @transform_6, window_bounds = array<i64: 1, 128>}, {transform_indices = @transform_7, window_bounds = array<i64: 8, 128>}]} {
    %c0_i32 = arith.constant 0 : i32
    %0 = arith.cmpi eq, %arg1, %c0_i32 : i32
    %1 = arith.extui %0 : i1 to i32
    %c0_i32_0 = arith.constant 0 : i32
    %2 = arith.cmpi ne, %1, %c0_i32_0 : i32
    scf.if %2 {
      %cst_14 = arith.constant 0.000000e+00 : f32
      %20 = vector.broadcast %cst_14 : f32 to vector<8x128xf32>
      %c0_15 = arith.constant 0 : index
      %c0_16 = arith.constant 0 : index
      %21 = vector.load %arg10[%c0_15, %c0_16] : memref<8x128xf32, #tpu.memory_space<vmem>>, vector<8x128xf32>
      tpu.vector_store %arg10[%c0_15, %c0_16], %20 {strides = array<i32>} : memref<8x128xf32, #tpu.memory_space<vmem>>, vector<8x128xf32>,
    } else {
    }
    %c0 = arith.constant 0 : index
    %c0_1 = arith.constant 0 : index
    %c0_2 = arith.constant 0 : index
    %3 = vector.load %arg2[%c0, %c0_1, %c0_2] : memref<8x128x128xbf16, #tpu.memory_space<vmem>>, vector<8x128x128xbf16>
    %4 = vector.shape_cast %3 : vector<8x128x128xbf16> to vector<1024x128xbf16>
    %c0_3 = arith.constant 0 : index
    %c0_4 = arith.constant 0 : index
    %5 = vector.load %arg3[%c0_3, %c0_4] : memref<128x128xbf16, #tpu.memory_space<vmem>>, vector<128x128xbf16>
    %cst = arith.constant dense<0.000000e+00> : vector<1024x128xf32>
    %6 = tpu.matmul %4, %5, %cst {dimension_numbers = #tpu.dot_dimension_numbers<[1], [0], [0], [1], [0, 0, 1, 1], [], []>} : vector<1024x128xbf16>, vector<128x128xbf16>, vector<1024x128xf32> -> vector<1024x128xf32>
    %c0_5 = arith.constant 0 : index
    %c0_6 = arith.constant 0 : index
    %7 = vector.load %arg4[%c0_5, %c0_6] : memref<1x128xf32, #tpu.memory_space<vmem>>, vector<1x128xf32>
    %8 = vector.broadcast %7 : vector<1x128xf32> to vector<1024x128xf32>
    %9 = arith.addf %6, %8 : vector<1024x128xf32>
    %cst_7 = arith.constant 0.000000e+00 : f32
    %10 = vector.broadcast %cst_7 : f32 to vector<1024x128xf32>
    %11 = arith.maximumf %9, %10 : vector<1024x128xf32>
    %c0_8 = arith.constant 0 : index
    %c0_9 = arith.constant 0 : index
    %12 = vector.load %arg10[%c0_8, %c0_9] : memref<8x128xf32, #tpu.memory_space<vmem>>, vector<8x128xf32>
    %13 = vector.shape_cast %11 : vector<1024x128xf32> to vector<8x128x128xf32>
    %cst_10 = arith.constant dense<0.000000e+00> : vector<8x128xf32>
    %14 = vector.multi_reduction <add>, %13, %cst_10 [1] : vector<8x128x128xf32> to vector<8x128xf32>
    %15 = arith.addf %12, %14 : vector<8x128xf32>
    %c0_11 = arith.constant 0 : index
    %c0_12 = arith.constant 0 : index
    %16 = vector.load %arg10[%c0_11, %c0_12] : memref<8x128xf32, #tpu.memory_space<vmem>>, vector<8x128xf32>
    tpu.vector_store %arg10[%c0_11, %c0_12], %15 {strides = array<i32>} : memref<8x128xf32, #tpu.memory_space<vmem>>, vector<8x128xf32>,
    %c1_i32 = arith.constant 1 : i32
    %17 = arith.cmpi eq, %arg1, %c1_i32 : i32
    %18 = arith.extui %17 : i1 to i32
    %c0_i32_13 = arith.constant 0 : i32
    %19 = arith.cmpi ne, %18, %c0_i32_13 : i32
    scf.if %19 {
      %c0_14 = arith.constant 0 : index
      %c0_15 = arith.constant 0 : index
      %20 = vector.load %arg10[%c0_14, %c0_15] : memref<8x128xf32, #tpu.memory_space<vmem>>, vector<8x128xf32>
      %cst_16 = arith.constant 3.906250e-03 : f32
      %21 = vector.broadcast %cst_16 : f32 to vector<8x128xf32>
      %22 = arith.mulf %20, %21 : vector<8x128xf32>
      %23 = arith.truncf %22 : vector<8x128xf32> to vector<8x128xbf16>
      %c0_17 = arith.constant 0 : index
      %c0_18 = arith.constant 0 : index
      %24 = vector.load %arg5[%c0_17, %c0_18] : memref<128x512xbf16, #tpu.memory_space<vmem>>, vector<128x512xbf16>
      %cst_19 = arith.constant dense<0.000000e+00> : vector<8x512xf32>
      %25 = tpu.matmul %23, %24, %cst_19 {dimension_numbers = #tpu.dot_dimension_numbers<[1], [0], [0], [1], [0, 0, 1, 1], [], []>} : vector<8x128xbf16>, vector<128x512xbf16>, vector<8x512xf32> -> vector<8x512xf32>
      %c0_20 = arith.constant 0 : index
      %c0_21 = arith.constant 0 : index
      %26 = vector.load %arg6[%c0_20, %c0_21] : memref<1x512xf32, #tpu.memory_space<vmem>>, vector<1x512xf32>
      %27 = vector.broadcast %26 : vector<1x512xf32> to vector<8x512xf32>
      %28 = arith.addf %25, %27 : vector<8x512xf32>
      %cst_22 = arith.constant 0.000000e+00 : f32
      %29 = vector.broadcast %cst_22 : f32 to vector<8x512xf32>
      %30 = arith.maximumf %28, %29 : vector<8x512xf32>
      %31 = arith.truncf %30 : vector<8x512xf32> to vector<8x512xbf16>
      %c0_23 = arith.constant 0 : index
      %c0_24 = arith.constant 0 : index
      %32 = vector.load %arg7[%c0_23, %c0_24] : memref<512x128xbf16, #tpu.memory_space<vmem>>, vector<512x128xbf16>
      %cst_25 = arith.constant dense<0.000000e+00> : vector<8x128xf32>
      %33 = tpu.matmul %31, %32, %cst_25 {dimension_numbers = #tpu.dot_dimension_numbers<[1], [0], [0], [1], [0, 0, 1, 1], [], []>} : vector<8x512xbf16>, vector<512x128xbf16>, vector<8x128xf32> -> vector<8x128xf32>
      %c0_26 = arith.constant 0 : index
      %c0_27 = arith.constant 0 : index
      %34 = vector.load %arg8[%c0_26, %c0_27] : memref<1x128xf32, #tpu.memory_space<vmem>>, vector<1x128xf32>
      %35 = vector.broadcast %34 : vector<1x128xf32> to vector<8x128xf32>
      %36 = arith.addf %33, %35 : vector<8x128xf32>
      %c0_28 = arith.constant 0 : index
      %c0_29 = arith.constant 0 : index
      %37 = vector.load %arg9[%c0_28, %c0_29] : memref<8x128xf32, #tpu.memory_space<vmem>>, vector<8x128xf32>
      tpu.vector_store %arg9[%c0_28, %c0_29], %36 {strides = array<i32>} : memref<8x128xf32, #tpu.memory_space<vmem>>, vector<8x128xf32>,
    } else {
    }
    return
  }
  func.func @transform_0(%arg0: i32, %arg1: i32) -> (i32, i32, i32) {
    %c0_i32 = arith.constant 0 : i32
    %c0_i32_0 = arith.constant 0 : i32
    return %arg0, %arg1, %c0_i32 : i32, i32, i32
  }
  func.func @transform_1(%arg0: i32, %arg1: i32) -> (i32, i32) {
    %c0_i32 = arith.constant 0 : i32
    %c0_i32_0 = arith.constant 0 : i32
    %c0_i32_1 = arith.constant 0 : i32
    return %c0_i32, %c0_i32_0 : i32, i32
  }
  func.func @transform_2(%arg0: i32, %arg1: i32) -> (i32, i32) {
    %c0_i32 = arith.constant 0 : i32
    %c0_i32_0 = arith.constant 0 : i32
    %c0_i32_1 = arith.constant 0 : i32
    return %c0_i32, %c0_i32_0 : i32, i32
  }
  func.func @transform_3(%arg0: i32, %arg1: i32) -> (i32, i32) {
    %c0_i32 = arith.constant 0 : i32
    %c0_i32_0 = arith.constant 0 : i32
    %c0_i32_1 = arith.constant 0 : i32
    return %c0_i32, %c0_i32_0 : i32, i32
  }
  func.func @transform_4(%arg0: i32, %arg1: i32) -> (i32, i32) {
    %c0_i32 = arith.constant 0 : i32
    %c0_i32_0 = arith.constant 0 : i32
    %c0_i32_1 = arith.constant 0 : i32
    return %c0_i32, %c0_i32_0 : i32, i32
  }
  func.func @transform_5(%arg0: i32, %arg1: i32) -> (i32, i32) {
    %c0_i32 = arith.constant 0 : i32
    %c0_i32_0 = arith.constant 0 : i32
    %c0_i32_1 = arith.constant 0 : i32
    return %c0_i32, %c0_i32_0 : i32, i32
  }
  func.func @transform_6(%arg0: i32, %arg1: i32) -> (i32, i32) {
    %c0_i32 = arith.constant 0 : i32
    %c0_i32_0 = arith.constant 0 : i32
    %c0_i32_1 = arith.constant 0 : i32
    return %c0_i32, %c0_i32_0 : i32, i32
  }
  func.func @transform_7(%arg0: i32, %arg1: i32) -> (i32, i32) {
    %c0_i32 = arith.constant 0 : i32
    %c0_i32_0 = arith.constant 0 : i32
    return %arg0, %c0_i32 : i32, i32
  }
}

</mosaic_0001>

<bundles_post_ra>
// kernel: network_forward.1
= control target key start
LH: loop header
LB: loop body
LE: loop exit
PB: predicated region body
PF: predicated region fallthrough
CT: control target
= control target key end

     0   :  { %s4629_s0 = inlined_call_operand.vmem [shape: bf16[16,256,128], index: 0, kind: input, shape index: {}]   ;;  %s4630_s1 = inlined_call_operand.vmem [shape: bf16[128,128], index: 1, kind: input, shape index: {}]   ;;  %s4631_s2 = inlined_call_operand.vmem [shape: f32[1,128], index: 2, kind: input, shape index: {}]   ;;  %s4632_s3 = inlined_call_operand.vmem [shape: bf16[128,512], index: 3, kind: input, shape index: {}]   ;;  %s4633_s4 = inlined_call_operand.vmem [shape: f32[1,512], index: 4, kind: input, shape index: {}]   ;;  %s4634_s5 = inlined_call_operand.vmem [shape: bf16[512,128], index: 5, kind: input, shape index: {}]   ;;  %s4635_s6 = inlined_call_operand.vmem [shape: f32[1,128], index: 6, kind: input, shape index: {}]   ;;  %s4636_s7 = inlined_call_operand.hbm [shape: f32[16,128], index: 7, kind: output, shape index: {}]  }
   0x1   :  { %4641 = sst [smem:[#allocation10_spill]] %s4629_s0 }
   0x2   :  { %12 = vsyncpa [#allocation5], 0 }
   0x3   :  { %14 = vsyncpa [#allocation5 + $0x1], 0  ;;  %s3880_s24 = smov 0   ;;  %s3882_s25 = smov 0  }
   0x4   :  { %s3884_s26 = smov 0   ;;  %s3886_s27 = smov 0  }
   0x5   :  { %s3888_s28 = smov 0   ;;  %s3890_s29 = smov 0  }
   0x6   :  { %s3892_s30 = smov 0   ;;  %s3894_s8 = smov 0  }
   0x7   :  { %s3896_s9 = smov 0   ;;  %s3898_s10 = smov 0  }
   0x8 LB: > { %s3050_s11 = sadd.s32 4294967295, %s3835_s10   ;;  %s3051_s12 = sadd.s32 4294967294, %s3835_s10   ;;  %s3835_s10 = sphi %s3898_s10, %s20_s10   ;;  %s3831_s9 = sphi %s3896_s9, %s4663_s9   ;;  %s3827_s8 = sphi %s3894_s8, %s4662_s8   ;;  %s3823_s30 = sphi %s3892_s30, %s4661_s30   ;;  %s3819_s29 = sphi %s3890_s29, %s4660_s29   ;;  %s3815_s28 = sphi %s3888_s28, %s4659_s28   ;;  %s3811_s27 = sphi %s3886_s27, %s4658_s27   ;;  %s3807_s26 = sphi %s3884_s26, %s4657_s26   ;;  %s3803_s25 = sphi %s3882_s25, %s4656_s25   ;;  %s3799_s24 = sphi %s3880_s24, %s4655_s24  }
   0x9   : > { %s29_s13 = sadd.s32 1, %s3827_s8  ;;  %s32_s14 = sadd.s32 1, %s3831_s9 }
   0xa   : > { %p30_p0 = scmp.ge.s32.totalorder %s29_s13, 2  ;;  %s41_s15 = sadd.s32 1, %s3815_s28 }
   0xb   : > { %p48_p1 = scmp.ne.s32.totalorder %s3815_s28, %s3811_s27  ;;  %p49_p2 = scmp.eq.s32.totalorder %s3835_s10, 0 }
   0xc   : > { %s4665_s13 = smov (%p30_p0, %s29_s13), 0  ;;  %s4667_s14 = smov (!%p30_p0, %s32_s14), %s3831_s9 }
   0xd   : > { %4642 = sst [smem:[#allocation7_spill]] %s4665_s13  ;;  %s37_s16 = ssub.s32 %s3827_s8, %s4665_s13 }
   0xe   : > { %p3943_p3 = por %p49_p2, %p48_p1  ;;  %p34_p4 = scmp.ge.s32.totalorder %s4667_s14, 2 }
   0xf   : > { %s193_s18 = sadd.s32 1, %s3807_s26  ;;  %p203_p5 = scmp.ne.s32.totalorder %s3807_s26, %s3803_s25 }
  0x10   : > { %p204_p6 = scmp.eq.s32.totalorder %s3050_s11, 3  ;;  %s4669_s14 = smov (%p34_p4, %s4667_s14), 0 }
  0x11   : > { %4644 = sst [smem:[#allocation8_spill]] %s4669_s14  ;;  %p209_p8 = scmp.ne.s32.totalorder %s3803_s25, %s3799_s24 }
  0x12   : > { %p3952_p7 = por %p204_p6, %p203_p5  ;;  %s36_s20 = ssub.s32 %s3831_s9, %s4669_s14 }
  0x13   : > { %p210_p9 = scmp.eq.s32.totalorder %s3051_s12, 3  ;;  %s38_s21 = sor.u32 %s37_s16, %s36_s20 }
  0x14   : > { %p191_p10 = scmp.eq.s32.totalorder %s36_s20, 0  ;;  %p39_p11 = scmp.eq.s32.totalorder %s38_s21, 0 }
  0x15   : > { %p3960_p12 = por %p210_p9, %p209_p8  ;;  %p3053_p13 = scmp.ge.s32.totalorder %s3835_s10, 4 }
  0x16   : > { %s3965_s23 = scalar_select %p191_p10, %s3807_s26, %s193_s18  }
  0x17   : > { %s4646_s22 = scalar_select %p3960_p12, 1, 0 }
  0x18   : > { %s3968_s11 = scalar_select %p39_p11, %s3815_s28, %s41_s15  }
  0x19   : > { %4647 = sst [smem:[#allocation9_spill]] %s4646_s22  ;;  %244 = sbr.rel (%p3053_p13) target bundleno = 74 (0x4a), region = 40 }
  0x20   : > { %247 = sbr.rel (!%p3943_p3) target bundleno = 74 (0x4a), region = 44  ;;  %s249_s12 = sand.u32 (%p3943_p3), 1, %s3815_s28  }
  0x21   : > { %s3056_s16 = sshll.u32 (%p3943_p3), %s3827_s8, 4  ;;  %s3054_s20 = sshll.u32 (%p3943_p3), %s249_s12, 9 }
  0x22   : > { %s3206_s21 = sshll.u32 (%p3943_p3), %s3831_s9, 8  ;;  %s4648_s0 = sld [smem:[#allocation10_spill]] (%p3943_p3) }
  0x23   : > { %s255_s14 = sadd.s32 (%p3943_p3), %s3206_s21, %s3056_s16  ;;  %s3984_s17 = scalar_lea.vmem (%p3943_p3), [#allocation3], %s3054_s20 }
  0x24   : > { %s3058_s13 = sshll.u32 (%p3943_p3), %s255_s14, 2 }
  0x28   : > { %s3979_s15 = scalar_lea.vmem %s4648_s0, %s3058_s13 }
  0x29   : > { %v273_v0 = vld [vmem:[%s3979_s15] sm:$0xff]   ;;  %v277_v1 = vld [vmem:[%s3979_s15 + $0x8] sm:$0xff]   ;;  %v281_v2 = vld [vmem:[%s3979_s15 + $0x10] sm:$0xff]  }
  0x2a   : > { %274 = vst [vmem:[%s3984_s17] sm:$0xff] %v273_v0   ;;  %278 = vst [vmem:[%s3984_s17 + $0x8] sm:$0xff] %v277_v1   ;;  %v285_v3 = vld [vmem:[%s3979_s15 + $0x18] sm:$0xff]   ;;  %v289_v4 = vld [vmem:[%s3979_s15 + $0x20] sm:$0xff]  }
  0x2b   : > { %282 = vst [vmem:[%s3984_s17 + $0x10] sm:$0xff] %v281_v2   ;;  %v293_v5 = vld [vmem:[%s3979_s15 + $0x28] sm:$0xff]   ;;  %286 = vst [vmem:[%s3984_s17 + $0x18] sm:$0xff] %v285_v3   ;;  %v297_v6 = vld [vmem:[%s3979_s15 + $0x30] sm:$0xff]  }
  0x2c   : > { %290 = vst [vmem:[%s3984_s17 + $0x20] sm:$0xff] %v289_v4   ;;  %294 = vst [vmem:[%s3984_s17 + $0x28] sm:$0xff] %v293_v5   ;;  %v301_v7 = vld [vmem:[%s3979_s15 + $0x38] sm:$0xff]   ;;  %v305_v8 = vld [vmem:[%s3979_s15 + $0x80] sm:$0xff]  }
  0x2d   : > { %298 = vst [vmem:[%s3984_s17 + $0x30] sm:$0xff] %v297_v6   ;;  %302 = vst [vmem:[%s3984_s17 + $0x38] sm:$0xff] %v301_v7   ;;  %v309_v9 = vld [vmem:[%s3979_s15 + $0x88] sm:$0xff]   ;;  %v313_v10 = vld [vmem:[%s3979_s15 + $0x90] sm:$0xff]  }
  0x2e   : > { %306 = vst [vmem:[%s3984_s17 + $0x40] sm:$0xff] %v305_v8   ;;  %v317_v11 = vld [vmem:[%s3979_s15 + $0x98] sm:$0xff]   ;;  %310 = vst [vmem:[%s3984_s17 + $0x48] sm:$0xff] %v309_v9   ;;  %v321_v12 = vld [vmem:[%s3979_s15 + $0xa0] sm:$0xff]  }
  0x2f   : > { %314 = vst [vmem:[%s3984_s17 + $0x50] sm:$0xff] %v313_v10   ;;  %318 = vst [vmem:[%s3984_s17 + $0x58] sm:$0xff] %v317_v11   ;;  %v325_v13 = vld [vmem:[%s3979_s15 + $0xa8] sm:$0xff]   ;;  %v329_v14 = vld [vmem:[%s3979_s15 + $0xb0] sm:$0xff]  }
  0x30   : > { %322 = vst [vmem:[%s3984_s17 + $0x60] sm:$0xff] %v321_v12   ;;  %326 = vst [vmem:[%s3984_s17 + $0x68] sm:$0xff] %v325_v13   ;;  %v333_v15 = vld [vmem:[%s3979_s15 + $0xb8] sm:$0xff]   ;;  %v337_v16 = vld [vmem:[%s3979_s15 + $0x100] sm:$0xff]  }
  0x31   : > { %330 = vst [vmem:[%s3984_s17 + $0x70] sm:$0xff] %v329_v14   ;;  %v341_v17 = vld [vmem:[%s3979_s15 + $0x108] sm:$0xff]   ;;  %334 = vst [vmem:[%s3984_s17 + $0x78] sm:$0xff] %v333_v15   ;;  %v345_v18 = vld [vmem:[%s3979_s15 + $0x110] sm:$0xff]  }
  0x32   : > { %338 = vst [vmem:[%s3984_s17 + $0x80] sm:$0xff] %v337_v16   ;;  %342 = vst [vmem:[%s3984_s17 + $0x88] sm:$0xff] %v341_v17   ;;  %v349_v19 = vld [vmem:[%s3979_s15 + $0x118] sm:$0xff]   ;;  %v353_v20 = vld [vmem:[%s3979_s15 + $0x120] sm:$0xff]  }
  0x33   : > { %346 = vst [vmem:[%s3984_s17 + $0x90] sm:$0xff] %v345_v18   ;;  %350 = vst [vmem:[%s3984_s17 + $0x98] sm:$0xff] %v349_v19   ;;  %v357_v21 = vld [vmem:[%s3979_s15 + $0x128] sm:$0xff]   ;;  %v361_v22 = vld [vmem:[%s3979_s15 + $0x130] sm:$0xff]  }
  0x34   : > { %354 = vst [vmem:[%s3984_s17 + $0xa0] sm:$0xff] %v353_v20   ;;  %v365_v23 = vld [vmem:[%s3979_s15 + $0x138] sm:$0xff]   ;;  %358 = vst [vmem:[%s3984_s17 + $0xa8] sm:$0xff] %v357_v21   ;;  %v369_v24 = vld [vmem:[%s3979_s15 + $0x180] sm:$0xff]  }
  0x35   : > { %362 = vst [vmem:[%s3984_s17 + $0xb0] sm:$0xff] %v361_v22   ;;  %366 = vst [vmem:[%s3984_s17 + $0xb8] sm:$0xff] %v365_v23   ;;  %v373_v25 = vld [vmem:[%s3979_s15 + $0x188] sm:$0xff]   ;;  %v377_v26 = vld [vmem:[%s3979_s15 + $0x190] sm:$0xff]  }
  0x36   : > { %370 = vst [vmem:[%s3984_s17 + $0xc0] sm:$0xff] %v369_v24   ;;  %374 = vst [vmem:[%s3984_s17 + $0xc8] sm:$0xff] %v373_v25   ;;  %v381_v27 = vld [vmem:[%s3979_s15 + $0x198] sm:$0xff]   ;;  %v385_v28 = vld [vmem:[%s3979_s15 + $0x1a0] sm:$0xff]  }
  0x37   : > { %378 = vst [vmem:[%s3984_s17 + $0xd0] sm:$0xff] %v377_v26   ;;  %v389_v29 = vld [vmem:[%s3979_s15 + $0x1a8] sm:$0xff]   ;;  %382 = vst [vmem:[%s3984_s17 + $0xd8] sm:$0xff] %v381_v27   ;;  %v393_v30 = vld [vmem:[%s3979_s15 + $0x1b0] sm:$0xff]  }
  0x38   : > { %386 = vst [vmem:[%s3984_s17 + $0xe0] sm:$0xff] %v385_v28   ;;  %390 = vst [vmem:[%s3984_s17 + $0xe8] sm:$0xff] %v389_v29   ;;  %v397_v31 = vld [vmem:[%s3979_s15 + $0x1b8] sm:$0xff]   ;;  %v401_v32 = vld [vmem:[%s3979_s15 + $0x200] sm:$0xff]  }
  0x39   : > { %394 = vst [vmem:[%s3984_s17 + $0xf0] sm:$0xff] %v393_v30   ;;  %398 = vst [vmem:[%s3984_s17 + $0xf8] sm:$0xff] %v397_v31   ;;  %v405_v33 = vld [vmem:[%s3979_s15 + $0x208] sm:$0xff]   ;;  %v409_v34 = vld [vmem:[%s3979_s15 + $0x210] sm:$0xff]  }
  0x3a   : > { %402 = vst [vmem:[%s3984_s17 + $0x100] sm:$0xff] %v401_v32   ;;  %v413_v35 = vld [vmem:[%s3979_s15 + $0x218] sm:$0xff]   ;;  %406 = vst [vmem:[%s3984_s17 + $0x108] sm:$0xff] %v405_v33   ;;  %v417_v36 = vld [vmem:[%s3979_s15 + $0x220] sm:$0xff]  }
  0x3b   : > { %410 = vst [vmem:[%s3984_s17 + $0x110] sm:$0xff] %v409_v34   ;;  %414 = vst [vmem:[%s3984_s17 + $0x118] sm:$0xff] %v413_v35   ;;  %v421_v37 = vld [vmem:[%s3979_s15 + $0x228] sm:$0xff]   ;;  %v425_v38 = vld [vmem:[%s3979_s15 + $0x230] sm:$0xff]  }
  0x3c   : > { %418 = vst [vmem:[%s3984_s17 + $0x120] sm:$0xff] %v417_v36   ;;  %422 = vst [vmem:[%s3984_s17 + $0x128] sm:$0xff] %v421_v37   ;;  %v429_v39 = vld [vmem:[%s3979_s15 + $0x238] sm:$0xff]   ;;  %v433_v40 = vld [vmem:[%s3979_s15 + $0x280] sm:$0xff]  }
  0x3d   : > { %426 = vst [vmem:[%s3984_s17 + $0x130] sm:$0xff] %v425_v38   ;;  %v437_v41 = vld [vmem:[%s3979_s15 + $0x288] sm:$0xff]   ;;  %430 = vst [vmem:[%s3984_s17 + $0x138] sm:$0xff] %v429_v39   ;;  %v441_v42 = vld [vmem:[%s3979_s15 + $0x290] sm:$0xff]  }
  0x3e   : > { %434 = vst [vmem:[%s3984_s17 + $0x140] sm:$0xff] %v433_v40   ;;  %438 = vst [vmem:[%s3984_s17 + $0x148] sm:$0xff] %v437_v41   ;;  %v445_v43 = vld [vmem:[%s3979_s15 + $0x298] sm:$0xff]   ;;  %v449_v44 = vld [vmem:[%s3979_s15 + $0x2a0] sm:$0xff]  }
  0x3f   : > { %442 = vst [vmem:[%s3984_s17 + $0x150] sm:$0xff] %v441_v42   ;;  %446 = vst [vmem:[%s3984_s17 + $0x158] sm:$0xff] %v445_v43   ;;  %v453_v45 = vld [vmem:[%s3979_s15 + $0x2a8] sm:$0xff]   ;;  %v457_v46 = vld [vmem:[%s3979_s15 + $0x2b0] sm:$0xff]  }
  0x40   : > { %450 = vst [vmem:[%s3984_s17 + $0x160] sm:$0xff] %v449_v44   ;;  %v461_v47 = vld [vmem:[%s3979_s15 + $0x2b8] sm:$0xff]   ;;  %454 = vst [vmem:[%s3984_s17 + $0x168] sm:$0xff] %v453_v45   ;;  %v465_v48 = vld [vmem:[%s3979_s15 + $0x300] sm:$0xff]  }
  0x41   : > { %458 = vst [vmem:[%s3984_s17 + $0x170] sm:$0xff] %v457_v46   ;;  %462 = vst [vmem:[%s3984_s17 + $0x178] sm:$0xff] %v461_v47   ;;  %v469_v49 = vld [vmem:[%s3979_s15 + $0x308] sm:$0xff]   ;;  %v473_v50 = vld [vmem:[%s3979_s15 + $0x310] sm:$0xff]  }
  0x42   : > { %466 = vst [vmem:[%s3984_s17 + $0x180] sm:$0xff] %v465_v48   ;;  %470 = vst [vmem:[%s3984_s17 + $0x188] sm:$0xff] %v469_v49   ;;  %v477_v51 = vld [vmem:[%s3979_s15 + $0x318] sm:$0xff]   ;;  %v481_v52 = vld [vmem:[%s3979_s15 + $0x320] sm:$0xff]  }
  0x43   : > { %474 = vst [vmem:[%s3984_s17 + $0x190] sm:$0xff] %v473_v50   ;;  %v485_v53 = vld [vmem:[%s3979_s15 + $0x328] sm:$0xff]   ;;  %478 = vst [vmem:[%s3984_s17 + $0x198] sm:$0xff] %v477_v51   ;;  %v489_v54 = vld [vmem:[%s3979_s15 + $0x330] sm:$0xff]  }
  0x44   : > { %482 = vst [vmem:[%s3984_s17 + $0x1a0] sm:$0xff] %v481_v52   ;;  %486 = vst [vmem:[%s3984_s17 + $0x1a8] sm:$0xff] %v485_v53   ;;  %v493_v55 = vld [vmem:[%s3979_s15 + $0x338] sm:$0xff]   ;;  %v497_v56 = vld [vmem:[%s3979_s15 + $0x380] sm:$0xff]  }
  0x45   : > { %490 = vst [vmem:[%s3984_s17 + $0x1b0] sm:$0xff] %v489_v54   ;;  %494 = vst [vmem:[%s3984_s17 + $0x1b8] sm:$0xff] %v493_v55   ;;  %v501_v57 = vld [vmem:[%s3979_s15 + $0x388] sm:$0xff]   ;;  %v505_v58 = vld [vmem:[%s3979_s15 + $0x390] sm:$0xff]  }
  0x46   : > { %498 = vst [vmem:[%s3984_s17 + $0x1c0] sm:$0xff] %v497_v56   ;;  %v509_v59 = vld [vmem:[%s3979_s15 + $0x398] sm:$0xff]   ;;  %502 = vst [vmem:[%s3984_s17 + $0x1c8] sm:$0xff] %v501_v57   ;;  %v513_v60 = vld [vmem:[%s3979_s15 + $0x3a0] sm:$0xff]  }
  0x47   : > { %506 = vst [vmem:[%s3984_s17 + $0x1d0] sm:$0xff] %v505_v58   ;;  %510 = vst [vmem:[%s3984_s17 + $0x1d8] sm:$0xff] %v509_v59   ;;  %v517_v61 = vld [vmem:[%s3979_s15 + $0x3a8] sm:$0xff]   ;;  %v521_v62 = vld [vmem:[%s3979_s15 + $0x3b0] sm:$0xff]  }
  0x48   : > { %514 = vst [vmem:[%s3984_s17 + $0x1e0] sm:$0xff] %v513_v60   ;;  %518 = vst [vmem:[%s3984_s17 + $0x1e8] sm:$0xff] %v517_v61   ;;  %v525_v63 = vld [vmem:[%s3979_s15 + $0x3b8] sm:$0xff]  }
  0x49   : > { %522 = vst [vmem:[%s3984_s17 + $0x1f0] sm:$0xff] %v521_v62   ;;  %526 = vst [vmem:[%s3984_s17 + $0x1f8] sm:$0xff] %v525_v63  }
  0x4a PF: > { %p3059_p0 = scmp.ge.s32.totalorder %s3835_s10, 1  ;;  %p806_p1 = scmp.lt.s32.totalorder %s3835_s10, 5 }
  0x4c   : > { %p807_p2 = pnand %p3059_p0, %p806_p1 }
  0x4d   : > { %s813_s13 = sand.u32 (!%p807_p2), 1, %s3811_s27   ;;  %s4640_s14 = sand.u32 (!%p807_p2), 1, %s3803_s25  }
  0x4e   : > { %810 = sbr.rel (%p807_p2) target bundleno = 980 (0x3d4), region = 85  ;;  %s3060_s22 = sshll.u32 (!%p807_p2), %s813_s13, 9 }
  0x4f   : > { %s4117_s12 = sshll.u32 (!%p807_p2), %s4640_s14, 3  ;;  %s4119_s16 = scalar_lea.vmem (!%p807_p2), [#allocation3], %s3060_s22 }
  0x50   : > { %p3062_p3 = scmp.ne.s32.totalorder (!%p807_p2), %s3819_s29, 0 }
  0x55   : > { %850 = sbr.rel (%p3062_p3) target bundleno = 92 (0x5c), region = 93  ;;  %v3837_v0 = vmov (!%p3062_p3), 0.0  }
  0x56   : > { %851 = vst [vmem:[#allocation2] sm:$0xff] (!%p3062_p3), %v3837_v0 }
  0x5c PF: > { %v3572_v1 = vld [vmem:[%s4630_s1] sm:$0xff]   ;;  %v3573_v2 = vld [vmem:[%s4630_s1 + $0x8] sm:$0xff]   ;;  %v3574_v3 = vld [vmem:[%s4630_s1 + $0x10] sm:$0xff]   ;;  %vm2285_vm0 = vcmask 1041409   ;;  %vm2287_vm1 = vcmask 1042434   ;;  %vm2289_vm2 = vcmask 1043459  }
  0x5d   : > { %3323 = vmatprep.subr.bf16.mxu0 %v3572_v1  ;;  %3467 = vmatprep.subr.bf16.mxu1 %v3572_v1  ;;  %v3575_v4 = vld [vmem:[%s4630_s1 + $0x18] sm:$0xff]   ;;  %v3580_v5 = vld [vmem:[%s4119_s16] sm:$0xff]   ;;  %v3576_v7 = vld [vmem:[%s4630_s1 + $0x20] sm:$0xff]   ;;  %vm2291_vm3 = vcmask 1044484   ;;  %vm2293_vm4 = vcmask 1045509   ;;  %vm2295_vm5 = vcmask 1046534  }
  0x5e   : > { %3324 = vmatpush3.bf16.msra.mxu0 %v3572_v1  ;;  %3475 = vmatpush3.bf16.msra.mxu1 %v3572_v1  ;;  %v3581_v6 = vld [vmem:[%s4119_s16 + $0x100] sm:$0xff]   ;;  %v3578_v9 = vld [vmem:[%s4630_s1 + $0x30] sm:$0xff]   ;;  %v3579_v10 = vld [vmem:[%s4630_s1 + $0x38] sm:$0xff]   ;;  %vm2297_vm6 = vcmask 1047559   ;;  %p3136_p4 = scmp.ne.s32.totalorder %s3819_s29, 1 }
  0x5f   : > { %3325 = vmatprep.subr.bf16.mxu0 %v3573_v2  ;;  %3468 = vmatprep.subr.bf16.mxu1 %v3573_v2  ;;  %v3577_v8 = vld [vmem:[%s4630_s1 + $0x28] sm:$0xff]   ;;  %v3582_v11 = vld [vmem:[%s4119_s16 + $0x8] sm:$0xff]   ;;  %v3584_v13 = vld [vmem:[%s4119_s16 + $0x10] sm:$0xff]  }
  0x60   : > { %3339 = vmatprep.mubr.bf16.mxu0 %v3580_v5  ;;  %3403 = vmatprep.mubr.bf16.mxu1 %v3581_v6  ;;  %v3583_v12 = vld [vmem:[%s4119_s16 + $0x108] sm:$0xff]   ;;  %v3585_v14 = vld [vmem:[%s4119_s16 + $0x110] sm:$0xff]   ;;  %v3586_v15 = vld [vmem:[%s4119_s16 + $0x18] sm:$0xff]  }
  0x61   : > { %v3587_v16 = vld [vmem:[%s4119_s16 + $0x118] sm:$0xff]   ;;  %v3588_v17 = vld [vmem:[%s4119_s16 + $0x20] sm:$0xff]   ;;  %v3590_v19 = vld [vmem:[%s4119_s16 + $0x28] sm:$0xff]  }
  0x62   : > { %3326 = vmatpush3.bf16.msra.mxu0 %v3573_v2  ;;  %3476 = vmatpush3.bf16.msra.mxu1 %v3573_v2  ;;  %v3589_v18 = vld [vmem:[%s4119_s16 + $0x120] sm:$0xff]   ;;  %v3591_v20 = vld [vmem:[%s4119_s16 + $0x128] sm:$0xff]   ;;  %v3592_v21 = vld [vmem:[%s4119_s16 + $0x30] sm:$0xff]  }
  0x63   : > { %3327 = vmatprep.subr.bf16.mxu0 %v3574_v3  ;;  %3469 = vmatprep.subr.bf16.mxu1 %v3574_v3  ;;  %v3593_v22 = vld [vmem:[%s4119_s16 + $0x130] sm:$0xff]   ;;  %v3594_v23 = vld [vmem:[%s4119_s16 + $0x38] sm:$0xff]   ;;  %v3596_v25 = vld [vmem:[%s4119_s16 + $0x40] sm:$0xff]  }
  0x64   : > { %v3595_v24 = vld [vmem:[%s4119_s16 + $0x138] sm:$0xff]   ;;  %v3597_v26 = vld [vmem:[%s4119_s16 + $0x140] sm:$0xff]   ;;  %v3598_v27 = vld [vmem:[%s4119_s16 + $0x48] sm:$0xff]  }
  0x65   : > { %v3599_v28 = vld [vmem:[%s4119_s16 + $0x148] sm:$0xff]   ;;  %v3600_v29 = vld [vmem:[%s4119_s16 + $0x50] sm:$0xff]   ;;  %v3602_v31 = vld [vmem:[%s4119_s16 + $0x58] sm:$0xff]  }
  0x66   : > { %3328 = vmatpush3.bf16.msra.mxu0 %v3574_v3  ;;  %3477 = vmatpush3.bf16.msra.mxu1 %v3574_v3  ;;  %v3601_v30 = vld [vmem:[%s4119_s16 + $0x150] sm:$0xff]   ;;  %v3603_v32 = vld [vmem:[%s4119_s16 + $0x158] sm:$0xff]   ;;  %v3604_v33 = vld [vmem:[%s4119_s16 + $0x60] sm:$0xff]  }
  0x67   : > { %3329 = vmatprep.subr.bf16.mxu0 %v3575_v4  ;;  %3470 = vmatprep.subr.bf16.mxu1 %v3575_v4  ;;  %v3605_v34 = vld [vmem:[%s4119_s16 + $0x160] sm:$0xff]   ;;  %v3606_v35 = vld [vmem:[%s4119_s16 + $0x68] sm:$0xff]   ;;  %v3608_v37 = vld [vmem:[%s4119_s16 + $0x70] sm:$0xff]  }
  0x68   : > { %v3607_v36 = vld [vmem:[%s4119_s16 + $0x168] sm:$0xff]   ;;  %v3609_v38 = vld [vmem:[%s4119_s16 + $0x170] sm:$0xff]   ;;  %v3610_v39 = vld [vmem:[%s4119_s16 + $0x78] sm:$0xff]  }
  0x69   : > { %v3611_v40 = vld [vmem:[%s4119_s16 + $0x178] sm:$0xff]   ;;  %v3612_v41 = vld [vmem:[%s4119_s16 + $0x80] sm:$0xff]   ;;  %v3614_v43 = vld [vmem:[%s4119_s16 + $0x88] sm:$0xff]  }
  0x6a   : > { %3330 = vmatpush3.bf16.msra.mxu0 %v3575_v4  ;;  %3478 = vmatpush3.bf16.msra.mxu1 %v3575_v4  ;;  %v3613_v42 = vld [vmem:[%s4119_s16 + $0x180] sm:$0xff]   ;;  %v3615_v44 = vld [vmem:[%s4119_s16 + $0x188] sm:$0xff]   ;;  %v3616_v45 = vld [vmem:[%s4119_s16 + $0x90] sm:$0xff]  }
  0x6b   : > { %3331 = vmatprep.subr.bf16.mxu0 %v3576_v7  ;;  %3471 = vmatprep.subr.bf16.mxu1 %v3576_v7  ;;  %v3617_v46 = vld [vmem:[%s4119_s16 + $0x190] sm:$0xff]   ;;  %v3618_v47 = vld [vmem:[%s4119_s16 + $0x98] sm:$0xff]   ;;  %v3620_v49 = vld [vmem:[%s4119_s16 + $0xa0] sm:$0xff]  }
  0x6c   : > { %v3619_v48 = vld [vmem:[%s4119_s16 + $0x198] sm:$0xff]   ;;  %v3621_v50 = vld [vmem:[%s4119_s16 + $0x1a0] sm:$0xff]   ;;  %v3622_v51 = vld [vmem:[%s4119_s16 + $0xa8] sm:$0xff]  }
  0x6d   : > { %v3623_v52 = vld [vmem:[%s4119_s16 + $0x1a8] sm:$0xff]   ;;  %v3624_v53 = vld [vmem:[%s4119_s16 + $0xb0] sm:$0xff]   ;;  %v3626_v55 = vld [vmem:[%s4119_s16 + $0xb8] sm:$0xff]  }
  0x6e   : > { %3332 = vmatpush3.bf16.msra.mxu0 %v3576_v7  ;;  %3479 = vmatpush3.bf16.msra.mxu1 %v3576_v7  ;;  %v3625_v54 = vld [vmem:[%s4119_s16 + $0x1b0] sm:$0xff]   ;;  %v3627_v56 = vld [vmem:[%s4119_s16 + $0x1b8] sm:$0xff]   ;;  %v3628_v57 = vld [vmem:[%s4119_s16 + $0xc0] sm:$0xff]  }
  0x6f   : > { %3333 = vmatprep.subr.bf16.mxu0 %v3577_v8  ;;  %3472 = vmatprep.subr.bf16.mxu1 %v3577_v8  ;;  %v3629_v58 = vld [vmem:[%s4119_s16 + $0x1c0] sm:$0xff]   ;;  %v3630_v59 = vld [vmem:[%s4119_s16 + $0xc8] sm:$0xff]   ;;  %v3632_v61 = vld [vmem:[%s4119_s16 + $0xd0] sm:$0xff]  }
  0x70   : > { %v3631_v60 = vld [vmem:[%s4119_s16 + $0x1c8] sm:$0xff]   ;;  %v3633_v62 = vld [vmem:[%s4119_s16 + $0x1d0] sm:$0xff]   ;;  %v3634_v63 = vld [vmem:[%s4119_s16 + $0xd8] sm:$0xff]  }
  0x71   : > { %v3635_v0 = vld [vmem:[%s4119_s16 + $0x1d8] sm:$0xff]   ;;  %v3636_v1 = vld [vmem:[%s4119_s16 + $0xe0] sm:$0xff]   ;;  %v3638_v3 = vld [vmem:[%s4119_s16 + $0xe8] sm:$0xff]  }
  0x72   : > { %3334 = vmatpush3.bf16.msra.mxu0 %v3577_v8  ;;  %3480 = vmatpush3.bf16.msra.mxu1 %v3577_v8  ;;  %v3637_v2 = vld [vmem:[%s4119_s16 + $0x1e0] sm:$0xff]   ;;  %v3639_v4 = vld [vmem:[%s4119_s16 + $0x1e8] sm:$0xff]   ;;  %v3640_v5 = vld [vmem:[%s4119_s16 + $0xf0] sm:$0xff]  }
  0x73   : > { %3335 = vmatprep.subr.bf16.mxu0 %v3578_v9  ;;  %3473 = vmatprep.subr.bf16.mxu1 %v3578_v9  ;;  %v3641_v6 = vld [vmem:[%s4119_s16 + $0x1f0] sm:$0xff]   ;;  %v3642_v7 = vld [vmem:[%s4119_s16 + $0xf8] sm:$0xff]  }
  0x74   : > { %v3643_v8 = vld [vmem:[%s4119_s16 + $0x1f8] sm:$0xff]   ;;  %s4649_s16 = scalar_lea.vmem (!%p3136_p4), [#allocation4], %s4117_s12 }
  0x76   : > { %3336 = vmatpush3.bf16.msra.mxu0 %v3578_v9  ;;  %3481 = vmatpush3.bf16.msra.mxu1 %v3578_v9  ;;  %v4214_v9 = vld [vmem:[%s4631_s2] ss:$0 sm:$0xff] }
  0x77   : > { %3337 = vmatprep.subr.bf16.mxu0 %v3579_v10  ;;  %3474 = vmatprep.subr.bf16.mxu1 %v3579_v10 }
  0x7a   : > { %3338 = vmatpush3.bf16.msra.mxu0 %v3579_v10  ;;  %3482 = vmatpush3.bf16.msra.mxu1 %v3579_v10 }
  0x7d   : > { %3340 = vmatmul.mubr.bf16.vlgmr.msra.gmra.mrb[0].mxu0 %v3582_v11  ;;  %3404 = vmatmul.mubr.bf16.vlgmr.msra.gmra.mrb[0].mxu1 %v3583_v12 }
  0x7e   : > { %3343 = vmatprep.mubr.bf16.mxu0 %v3584_v13  ;;  %3407 = vmatprep.mubr.bf16.mxu1 %v3585_v14 }
  0x85   : > { %3344 = vmatmul.mubr.bf16.gmra.mrb[4].mxu0 %v3586_v15  ;;  %3408 = vmatmul.mubr.bf16.gmra.mrb[4].mxu1 %v3587_v16 }
  0x86   : > { %3347 = vmatprep.mubr.bf16.mxu0 %v3588_v17  ;;  %3411 = vmatprep.mubr.bf16.mxu1 %v3589_v18 }
  0x8d   : > { %3348 = vmatmul.mubr.bf16.gmra.mrb[8].mxu0 %v3590_v19  ;;  %3412 = vmatmul.mubr.bf16.gmra.mrb[8].mxu1 %v3591_v20 }
  0x8e   : > { %3351 = vmatprep.mubr.bf16.mxu0 %v3592_v21  ;;  %3415 = vmatprep.mubr.bf16.mxu1 %v3593_v22 }
  0x95   : > { %3352 = vmatmul.mubr.bf16.gmra.mrb[12].mxu0 %v3594_v23  ;;  %3416 = vmatmul.mubr.bf16.gmra.mrb[12].mxu1 %v3595_v24 }
  0x96   : > { %3355 = vmatprep.mubr.bf16.mxu0 %v3596_v25  ;;  %3419 = vmatprep.mubr.bf16.mxu1 %v3597_v26 }
  0x9d   : > { %3356 = vmatmul.mubr.bf16.gmra.mrb[16].mxu0 %v3598_v27  ;;  %3420 = vmatmul.mubr.bf16.gmra.mrb[16].mxu1 %v3599_v28 }
  0x9e   : > { %3359 = vmatprep.mubr.bf16.mxu0 %v3600_v29  ;;  %3423 = vmatprep.mubr.bf16.mxu1 %v3601_v30 }
  0xa5   : > { %3360 = vmatmul.mubr.bf16.gmra.mrb[20].mxu0 %v3602_v31  ;;  %3424 = vmatmul.mubr.bf16.gmra.mrb[20].mxu1 %v3603_v32 }
  0xa6   : > { %3363 = vmatprep.mubr.bf16.mxu0 %v3604_v33  ;;  %3427 = vmatprep.mubr.bf16.mxu1 %v3605_v34 }
  0xad   : > { %3364 = vmatmul.mubr.bf16.gmra.mrb[24].mxu0 %v3606_v35  ;;  %3428 = vmatmul.mubr.bf16.gmra.mrb[24].mxu1 %v3607_v36 }
  0xae   : > { %3367 = vmatprep.mubr.bf16.mxu0 %v3608_v37  ;;  %3431 = vmatprep.mubr.bf16.mxu1 %v3609_v38 }
  0xb5   : > { %3368 = vmatmul.mubr.bf16.gmra.mrb[28].mxu0 %v3610_v39  ;;  %3432 = vmatmul.mubr.bf16.gmra.mrb[28].mxu1 %v3611_v40 }
  0xb6   : > { %3371 = vmatprep.mubr.bf16.mxu0 %v3612_v41  ;;  %3435 = vmatprep.mubr.bf16.mxu1 %v3613_v42 }
  0xbd   : > { %3372 = vmatmul.mubr.bf16.gmra.mrb[32].mxu0 %v3614_v43  ;;  %3436 = vmatmul.mubr.bf16.gmra.mrb[32].mxu1 %v3615_v44 }
  0xbe   : > { %3375 = vmatprep.mubr.bf16.mxu0 %v3616_v45  ;;  %3439 = vmatprep.mubr.bf16.mxu1 %v3617_v46 }
  0xc5   : > { %3376 = vmatmul.mubr.bf16.gmra.mrb[36].mxu0 %v3618_v47  ;;  %3440 = vmatmul.mubr.bf16.gmra.mrb[36].mxu1 %v3619_v48 }
  0xc6   : > { %3379 = vmatprep.mubr.bf16.mxu0 %v3620_v49  ;;  %3443 = vmatprep.mubr.bf16.mxu1 %v3621_v50 }
  0xcd   : > { %3380 = vmatmul.mubr.bf16.gmra.mrb[40].mxu0 %v3622_v51  ;;  %3444 = vmatmul.mubr.bf16.gmra.mrb[40].mxu1 %v3623_v52 }
  0xce   : > { %3383 = vmatprep.mubr.bf16.mxu0 %v3624_v53  ;;  %3447 = vmatprep.mubr.bf16.mxu1 %v3625_v54 }
  0xd5   : > { %3384 = vmatmul.mubr.bf16.gmra.mrb[44].mxu0 %v3626_v55  ;;  %3448 = vmatmul.mubr.bf16.gmra.mrb[44].mxu1 %v3627_v56 }
  0xd6   : > { %3387 = vmatprep.mubr.bf16.mxu0 %v3628_v57  ;;  %3451 = vmatprep.mubr.bf16.mxu1 %v3629_v58 }
  0xdd   : > { %3388 = vmatmul.mubr.bf16.gmra.mrb[48].mxu0 %v3630_v59  ;;  %3452 = vmatmul.mubr.bf16.gmra.mrb[48].mxu1 %v3631_v60 }
  0xde   : > { %3391 = vmatprep.mubr.bf16.mxu0 %v3632_v61  ;;  %3455 = vmatprep.mubr.bf16.mxu1 %v3633_v62 }
  0xe5   : > { %3392 = vmatmul.mubr.bf16.gmra.mrb[52].mxu0 %v3634_v63  ;;  %3456 = vmatmul.mubr.bf16.gmra.mrb[52].mxu1 %v3635_v0 }
  0xe6   : > { %3395 = vmatprep.mubr.bf16.mxu0 %v3636_v1  ;;  %3459 = vmatprep.mubr.bf16.mxu1 %v3637_v2 }
  0xed   : > { %3396 = vmatmul.mubr.bf16.gmra.mrb[56].mxu0 %v3638_v3  ;;  %3460 = vmatmul.mubr.bf16.gmra.mrb[56].mxu1 %v3639_v4 }
  0xee   : > { %3399 = vmatprep.mubr.bf16.mxu0 %v3640_v5  ;;  %3463 = vmatprep.mubr.bf16.mxu1 %v3641_v6 }
  0xf5   : > { %3400 = vmatmul.mubr.bf16.gmra.mrb[60].mxu0 %v3642_v7  ;;  %3464 = vmatmul.mubr.bf16.gmra.mrb[60].mxu1 %v3643_v8 }
 0x150   : > { %v3341_v10 = vpop.f32.mrb[0].mxu0  ;;  %v3405_v11 = vpop.f32.mrb[0].mxu1 }
 0x151   : > { %v1469_v12 = vpop.f32.mrb[1].mxu0  ;;  %v1725_v13 = vpop.f32.mrb[1].mxu1  ;;  %v1734_v14 = vadd.f32 %v3405_v11, %v4214_v9  ;;  %v1478_v21 = vadd.f32 %v3341_v10, %v4214_v9 }
 0x152   : > { %v1470_v15 = vadd.f32 %v4214_v9, %v1469_v12  ;;  %v1726_v16 = vadd.f32 %v4214_v9, %v1725_v13  ;;  %v3342_v17 = vpop.f32.mrb[2].mxu0  ;;  %v3406_v18 = vpop.f32.mrb[2].mxu1 }
 0x153   : > { %v1472_v19 = vpop.f32.mrb[3].mxu0  ;;  %v1728_v20 = vpop.f32.mrb[3].mxu1  ;;  %v1481_v25 = vadd.f32 %v3342_v17, %v4214_v9  ;;  %v1737_v26 = vadd.f32 %v3406_v18, %v4214_v9  ;;  %v2046_v27 = vmax.f32 %v1734_v14, 0.0  ;;  %v1982_v31 = vmax.f32 %v1478_v21, 0.0 }
 0x154   : > { %v2044_v22 = vmax.f32 %v1726_v16, 0.0  ;;  %v1473_v23 = vadd.f32 %v4214_v9, %v1472_v19  ;;  %v1729_v24 = vadd.f32 %v4214_v9, %v1728_v20  ;;  %v1980_v28 = vmax.f32 %v1470_v15, 0.0 }
 0x155   : > { %v1983_v36 = vmax.f32 %v1481_v25, 0.0  ;;  %v2047_v37 = vmax.f32 %v1737_v26, 0.0 }
 0x156   : > { %v1981_v29 = vmax.f32 %v1473_v23, 0.0  ;;  %v2045_v30 = vmax.f32 %v1729_v24, 0.0 }
 0x158   : > { %v2109_v32 = vadd.f32 %v1981_v29, %v1980_v28  ;;  %v2193_v33 = vadd.f32 %v2045_v30, %v2044_v22  ;;  %v3345_v34 = vpop.f32.mrb[4].mxu0  ;;  %v3409_v35 = vpop.f32.mrb[4].mxu1 }
 0x159   : > { %v1750_v38 = vadd.f32 %v3409_v35, %v4214_v9  ;;  %v1485_v39 = vpop.f32.mrb[5].mxu0  ;;  %v1741_v40 = vpop.f32.mrb[5].mxu1  ;;  %v1494_v53 = vadd.f32 %v3345_v34, %v4214_v9 }
 0x15a   : > { %v2110_v41 = vadd.f32 %v2109_v32, %v1982_v31  ;;  %v2194_v42 = vadd.f32 %v2193_v33, %v2046_v27  ;;  %v1486_v43 = vadd.f32 %v4214_v9, %v1485_v39  ;;  %v1742_v44 = vadd.f32 %v4214_v9, %v1741_v40  ;;  %v3346_v45 = vpop.f32.mrb[6].mxu0  ;;  %v3410_v46 = vpop.f32.mrb[6].mxu1 }
 0x15b   : > { %v1488_v47 = vpop.f32.mrb[7].mxu0  ;;  %v1744_v48 = vpop.f32.mrb[7].mxu1  ;;  %v2050_v56 = vmax.f32 %v1750_v38, 0.0  ;;  %v1497_v59 = vadd.f32 %v3346_v45, %v4214_v9  ;;  %v1753_v60 = vadd.f32 %v3410_v46, %v4214_v9  ;;  %v1986_v1 = vmax.f32 %v1494_v53, 0.0 }
 0x15c   : > { %v1984_v49 = vmax.f32 %v1486_v43, 0.0  ;;  %v2111_v50 = vadd.f32 %v2110_v41, %v1983_v36  ;;  %v2048_v51 = vmax.f32 %v1742_v44, 0.0  ;;  %v2195_v52 = vadd.f32 %v2194_v42, %v2047_v37 }
 0x15d   : > { %v1489_v54 = vadd.f32 %v4214_v9, %v1488_v47  ;;  %v1745_v55 = vadd.f32 %v4214_v9, %v1744_v48  ;;  %v1987_v12 = vmax.f32 %v1497_v59, 0.0  ;;  %v2051_v13 = vmax.f32 %v1753_v60, 0.0 }
 0x15e   : > { %v2112_v57 = vadd.f32 %v2111_v50, %v1984_v49  ;;  %v2196_v58 = vadd.f32 %v2195_v52, %v2048_v51 }
 0x15f   : > { %v1985_v61 = vmax.f32 %v1489_v54, 0.0  ;;  %v2049_v62 = vmax.f32 %v1745_v55, 0.0 }
 0x160   : > { %v3349_v63 = vpop.f32.mrb[8].mxu0  ;;  %v3413_v0 = vpop.f32.mrb[8].mxu1 }
 0x161   : > { %v2113_v2 = vadd.f32 %v2112_v57, %v1985_v61  ;;  %v2197_v3 = vadd.f32 %v2196_v58, %v2049_v62  ;;  %v1501_v4 = vpop.f32.mrb[9].mxu0  ;;  %v1757_v5 = vpop.f32.mrb[9].mxu1  ;;  %v1766_v6 = vadd.f32 %v3413_v0, %v4214_v9  ;;  %v1510_v18 = vadd.f32 %v3349_v63, %v4214_v9 }
 0x162   : > { %v1502_v7 = vadd.f32 %v4214_v9, %v1501_v4  ;;  %v1758_v8 = vadd.f32 %v4214_v9, %v1757_v5  ;;  %v3350_v10 = vpop.f32.mrb[10].mxu0  ;;  %v3414_v11 = vpop.f32.mrb[10].mxu1 }
 0x163   : > { %v2114_v14 = vadd.f32 %v2113_v2, %v1986_v1  ;;  %v2198_v15 = vadd.f32 %v2197_v3, %v2050_v56  ;;  %v1504_v16 = vpop.f32.mrb[11].mxu0  ;;  %v1760_v17 = vpop.f32.mrb[11].mxu1  ;;  %v2054_v25 = vmax.f32 %v1766_v6, 0.0  ;;  %v1513_v26 = vadd.f32 %v3350_v10, %v4214_v9 }
 0x164   : > { %v1988_v19 = vmax.f32 %v1502_v7, 0.0  ;;  %v2052_v20 = vmax.f32 %v1758_v8, 0.0  ;;  %v1505_v23 = vadd.f32 %v4214_v9, %v1504_v16  ;;  %v1761_v24 = vadd.f32 %v4214_v9, %v1760_v17 }
 0x165   : > { %v2115_v21 = vadd.f32 %v2114_v14, %v1987_v12  ;;  %v2199_v22 = vadd.f32 %v2198_v15, %v2051_v13  ;;  %v1769_v27 = vadd.f32 %v3414_v11, %v4214_v9  ;;  %v1990_v34 = vmax.f32 %v1510_v18, 0.0 }
 0x166   : > { %v1989_v30 = vmax.f32 %v1505_v23, 0.0  ;;  %v2053_v31 = vmax.f32 %v1761_v24, 0.0  ;;  %v1991_v44 = vmax.f32 %v1513_v26, 0.0 }
 0x167   : > { %v2116_v28 = vadd.f32 %v2115_v21, %v1988_v19  ;;  %v2200_v29 = vadd.f32 %v2199_v22, %v2052_v20  ;;  %v2055_v45 = vmax.f32 %v1769_v27, 0.0 }
 0x168   : > { %v3353_v32 = vpop.f32.mrb[12].mxu0  ;;  %v3417_v33 = vpop.f32.mrb[12].mxu1 }
 0x169   : > { %v2117_v35 = vadd.f32 %v2116_v28, %v1989_v30  ;;  %v2201_v36 = vadd.f32 %v2200_v29, %v2053_v31  ;;  %v1517_v37 = vpop.f32.mrb[13].mxu0  ;;  %v1773_v38 = vpop.f32.mrb[13].mxu1  ;;  %v1782_v39 = vadd.f32 %v3417_v33, %v4214_v9  ;;  %v1526_v50 = vadd.f32 %v3353_v32, %v4214_v9 }
 0x16a   : > { %v1518_v40 = vadd.f32 %v4214_v9, %v1517_v37  ;;  %v1774_v41 = vadd.f32 %v4214_v9, %v1773_v38  ;;  %v3354_v42 = vpop.f32.mrb[14].mxu0  ;;  %v3418_v43 = vpop.f32.mrb[14].mxu1 }
 0x16b   : > { %v2118_v46 = vadd.f32 %v2117_v35, %v1990_v34  ;;  %v2202_v47 = vadd.f32 %v2201_v36, %v2054_v25  ;;  %v1520_v48 = vpop.f32.mrb[15].mxu0  ;;  %v1776_v49 = vpop.f32.mrb[15].mxu1  ;;  %v2058_v57 = vmax.f32 %v1782_v39, 0.0  ;;  %v1529_v58 = vadd.f32 %v3354_v42, %v4214_v9 }
 0x16c   : > { %v1992_v51 = vmax.f32 %v1518_v40, 0.0  ;;  %v2056_v52 = vmax.f32 %v1774_v41, 0.0  ;;  %v1521_v55 = vadd.f32 %v4214_v9, %v1520_v48  ;;  %v1777_v56 = vadd.f32 %v4214_v9, %v1776_v49 }
 0x16d   : > { %v2119_v53 = vadd.f32 %v2118_v46, %v1991_v44  ;;  %v2203_v54 = vadd.f32 %v2202_v47, %v2055_v45  ;;  %v1785_v59 = vadd.f32 %v3418_v43, %v4214_v9  ;;  %v1994_v2 = vmax.f32 %v1526_v50, 0.0 }
 0x16e   : > { %v1993_v62 = vmax.f32 %v1521_v55, 0.0  ;;  %v2057_v63 = vmax.f32 %v1777_v56, 0.0  ;;  %v1995_v13 = vmax.f32 %v1529_v58, 0.0 }
 0x16f   : > { %v2120_v60 = vadd.f32 %v2119_v53, %v1992_v51  ;;  %v2204_v61 = vadd.f32 %v2203_v54, %v2056_v52  ;;  %v2059_v14 = vmax.f32 %v1785_v59, 0.0 }
 0x170   : > { %v3357_v0 = vpop.f32.mrb[16].mxu0  ;;  %v3421_v1 = vpop.f32.mrb[16].mxu1 }
 0x171   : > { %v2121_v3 = vadd.f32 %v2120_v60, %v1993_v62  ;;  %v2205_v4 = vadd.f32 %v2204_v61, %v2057_v63  ;;  %v1533_v5 = vpop.f32.mrb[17].mxu0  ;;  %v1789_v6 = vpop.f32.mrb[17].mxu1  ;;  %v1798_v7 = vadd.f32 %v3421_v1, %v4214_v9  ;;  %v1542_v19 = vadd.f32 %v3357_v0, %v4214_v9 }
 0x172   : > { %v1534_v8 = vadd.f32 %v4214_v9, %v1533_v5  ;;  %v1790_v10 = vadd.f32 %v4214_v9, %v1789_v6  ;;  %v3358_v11 = vpop.f32.mrb[18].mxu0  ;;  %v3422_v12 = vpop.f32.mrb[18].mxu1 }
 0x173   : > { %v2122_v15 = vadd.f32 %v2121_v3, %v1994_v2  ;;  %v2206_v16 = vadd.f32 %v2205_v4, %v2058_v57  ;;  %v1536_v17 = vpop.f32.mrb[19].mxu0  ;;  %v1792_v18 = vpop.f32.mrb[19].mxu1  ;;  %v2062_v25 = vmax.f32 %v1798_v7, 0.0  ;;  %v1545_v27 = vadd.f32 %v3358_v11, %v4214_v9 }
 0x174   : > { %v2060_v20 = vmax.f32 %v1790_v10, 0.0  ;;  %v1537_v23 = vadd.f32 %v4214_v9, %v1536_v17  ;;  %v1793_v24 = vadd.f32 %v4214_v9, %v1792_v18  ;;  %v1996_v26 = vmax.f32 %v1534_v8, 0.0 }
 0x175   : > { %v4252_v21 = vadd.f32 %v2122_v15, %v1995_v13  ;;  %v4254_v22 = vadd.f32 %v2206_v16, %v2059_v14  ;;  %v1801_v28 = vadd.f32 %v3422_v12, %v4214_v9  ;;  %v1998_v33 = vmax.f32 %v1542_v19, 0.0 }
 0x176   : > { %v1997_v29 = vmax.f32 %v1537_v23, 0.0  ;;  %v2061_v30 = vmax.f32 %v1793_v24, 0.0  ;;  %v1999_v42 = vmax.f32 %v1545_v27, 0.0 }
 0x177   : > { %v2063_v43 = vmax.f32 %v1801_v28, 0.0 }
 0x178   : > { %v3361_v31 = vpop.f32.mrb[20].mxu0  ;;  %v3425_v32 = vpop.f32.mrb[20].mxu1  ;;  %v2130_v34 = vadd.f32 %v1997_v29, %v1996_v26  ;;  %v2214_v35 = vadd.f32 %v2061_v30, %v2060_v20 }
 0x179   : > { %v1549_v36 = vpop.f32.mrb[21].mxu0  ;;  %v1805_v37 = vpop.f32.mrb[21].mxu1  ;;  %v1814_v48 = vadd.f32 %v3425_v32, %v4214_v9  ;;  %v1558_v51 = vadd.f32 %v3361_v31, %v4214_v9 }
 0x17a   : > { %v1550_v38 = vadd.f32 %v4214_v9, %v1549_v36  ;;  %v1806_v39 = vadd.f32 %v4214_v9, %v1805_v37  ;;  %v3362_v40 = vpop.f32.mrb[22].mxu0  ;;  %v3426_v41 = vpop.f32.mrb[22].mxu1  ;;  %v2131_v44 = vadd.f32 %v2130_v34, %v1998_v33  ;;  %v2215_v45 = vadd.f32 %v2214_v35, %v2062_v25 }
 0x17b   : > { %v1552_v46 = vpop.f32.mrb[23].mxu0  ;;  %v1808_v47 = vpop.f32.mrb[23].mxu1  ;;  %v1561_v58 = vadd.f32 %v3362_v40, %v4214_v9  ;;  %v1817_v59 = vadd.f32 %v3426_v41, %v4214_v9  ;;  %v2066_v60 = vmax.f32 %v1814_v48, 0.0  ;;  %v2002_v1 = vmax.f32 %v1558_v51, 0.0 }
 0x17c   : > { %v2000_v49 = vmax.f32 %v1550_v38, 0.0  ;;  %v2064_v50 = vmax.f32 %v1806_v39, 0.0  ;;  %v2132_v52 = vadd.f32 %v2131_v44, %v1999_v42  ;;  %v2216_v53 = vadd.f32 %v2215_v45, %v2063_v43 }
 0x17d   : > { %v1553_v54 = vadd.f32 %v4214_v9, %v1552_v46  ;;  %v1809_v55 = vadd.f32 %v4214_v9, %v1808_v47  ;;  %v2003_v11 = vmax.f32 %v1561_v58, 0.0  ;;  %v2067_v12 = vmax.f32 %v1817_v59, 0.0 }
 0x17e   : > { %v2133_v56 = vadd.f32 %v2132_v52, %v2000_v49  ;;  %v2217_v57 = vadd.f32 %v2216_v53, %v2064_v50  ;;  %v2124_v45 = vrot.slane %v4252_v21, 4 }
 0x17f   : > { %v2001_v61 = vmax.f32 %v1553_v54, 0.0  ;;  %v2065_v62 = vmax.f32 %v1809_v55, 0.0 }
 0x180   : > { %v3365_v63 = vpop.f32.mrb[24].mxu0  ;;  %v3429_v0 = vpop.f32.mrb[24].mxu1 }
 0x181   : > { %v1565_v2 = vpop.f32.mrb[25].mxu0  ;;  %v1821_v3 = vpop.f32.mrb[25].mxu1  ;;  %v2134_v4 = vadd.f32 %v2133_v56, %v2001_v61  ;;  %v2218_v5 = vadd.f32 %v2217_v57, %v2065_v62  ;;  %v1830_v13 = vadd.f32 %v3429_v0, %v4214_v9  ;;  %v1574_v20 = vadd.f32 %v3365_v63, %v4214_v9 }
 0x182   : > { %v1566_v6 = vadd.f32 %v4214_v9, %v1565_v2  ;;  %v1822_v7 = vadd.f32 %v4214_v9, %v1821_v3  ;;  %v3366_v8 = vpop.f32.mrb[26].mxu0  ;;  %v3430_v10 = vpop.f32.mrb[26].mxu1 }
 0x183   : > { %v1568_v14 = vpop.f32.mrb[27].mxu0  ;;  %v1824_v15 = vpop.f32.mrb[27].mxu1  ;;  %v2135_v16 = vadd.f32 %v2134_v4, %v2002_v1  ;;  %v2219_v17 = vadd.f32 %v2218_v5, %v2066_v60  ;;  %v1577_v27 = vadd.f32 %v3366_v8, %v4214_v9  ;;  %v1833_v28 = vadd.f32 %v3430_v10, %v4214_v9 }
 0x184   : > { %v2004_v18 = vmax.f32 %v1566_v6, 0.0  ;;  %v2068_v19 = vmax.f32 %v1822_v7, 0.0  ;;  %v1569_v23 = vadd.f32 %v4214_v9, %v1568_v14  ;;  %v1825_v24 = vadd.f32 %v4214_v9, %v1824_v15 }
 0x185   : > { %v2136_v25 = vadd.f32 %v2135_v16, %v2003_v11  ;;  %v2220_v26 = vadd.f32 %v2219_v17, %v2067_v12  ;;  %v2070_v31 = vmax.f32 %v1830_v13, 0.0  ;;  %v2006_v36 = vmax.f32 %v1574_v20, 0.0 }
 0x186   : > { %v2005_v29 = vmax.f32 %v1569_v23, 0.0  ;;  %v2069_v30 = vmax.f32 %v1825_v24, 0.0  ;;  %v2007_v46 = vmax.f32 %v1577_v27, 0.0  ;;  %v2071_v47 = vmax.f32 %v1833_v28, 0.0 }
 0x187   : > { %v2137_v32 = vadd.f32 %v2136_v25, %v2004_v18  ;;  %v2221_v33 = vadd.f32 %v2220_v26, %v2068_v19  ;;  %v2125_v60 = vadd.f32 %v2124_v45, %v4252_v21 }
 0x188   : > { %v3369_v34 = vpop.f32.mrb[28].mxu0  ;;  %v3433_v35 = vpop.f32.mrb[28].mxu1 }
 0x189   : > { %v1581_v37 = vpop.f32.mrb[29].mxu0  ;;  %v1837_v38 = vpop.f32.mrb[29].mxu1  ;;  %v2138_v39 = vadd.f32 %v2137_v32, %v2005_v29  ;;  %v2222_v40 = vadd.f32 %v2221_v33, %v2069_v30  ;;  %v1846_v48 = vadd.f32 %v3433_v35, %v4214_v9  ;;  %v1590_v55 = vadd.f32 %v3369_v34, %v4214_v9 }
 0x18a   : > { %v1582_v41 = vadd.f32 %v4214_v9, %v1581_v37  ;;  %v1838_v42 = vadd.f32 %v4214_v9, %v1837_v38  ;;  %v3370_v43 = vpop.f32.mrb[30].mxu0  ;;  %v3434_v44 = vpop.f32.mrb[30].mxu1  ;;  %v2126_v15 = vrot.slane %v2125_v60, 2 }
 0x18b   : > { %v1584_v49 = vpop.f32.mrb[31].mxu0  ;;  %v1840_v50 = vpop.f32.mrb[31].mxu1  ;;  %v2139_v51 = vadd.f32 %v2138_v39, %v2006_v36  ;;  %v2223_v52 = vadd.f32 %v2222_v40, %v2070_v31  ;;  %v2074_v61 = vmax.f32 %v1846_v48, 0.0  ;;  %v1593_v2 = vadd.f32 %v3370_v43, %v4214_v9 }
 0x18c   : > { %v2008_v53 = vmax.f32 %v1582_v41, 0.0  ;;  %v2072_v54 = vmax.f32 %v1838_v42, 0.0  ;;  %v1585_v56 = vadd.f32 %v4214_v9, %v1584_v49  ;;  %v1841_v57 = vadd.f32 %v4214_v9, %v1840_v50 }
 0x18d   : > { %v2140_v58 = vadd.f32 %v2139_v51, %v2007_v46  ;;  %v2224_v59 = vadd.f32 %v2223_v52, %v2071_v47  ;;  %v1849_v3 = vadd.f32 %v3434_v44, %v4214_v9  ;;  %v2010_v6 = vmax.f32 %v1590_v55, 0.0 }
 0x18e   : > { %v2009_v62 = vmax.f32 %v1585_v56, 0.0  ;;  %v2073_v63 = vmax.f32 %v1841_v57, 0.0  ;;  %v2011_v19 = vmax.f32 %v1593_v2, 0.0  ;;  %v2127_v40 = vadd.f32 %v2126_v15, %v2125_v60 }
 0x18f   : > { %v2141_v0 = vadd.f32 %v2140_v58, %v2008_v53  ;;  %v2225_v1 = vadd.f32 %v2224_v59, %v2072_v54  ;;  %v2075_v20 = vmax.f32 %v1849_v3, 0.0 }
 0x190   : > { %v3373_v4 = vpop.f32.mrb[32].mxu0  ;;  %v3437_v5 = vpop.f32.mrb[32].mxu1 }
 0x191   : > { %v1597_v7 = vpop.f32.mrb[33].mxu0  ;;  %v1853_v8 = vpop.f32.mrb[33].mxu1  ;;  %v2142_v10 = vadd.f32 %v2141_v0, %v2009_v62  ;;  %v2226_v11 = vadd.f32 %v2225_v1, %v2073_v63  ;;  %v1862_v12 = vadd.f32 %v3437_v5, %v4214_v9  ;;  %v1606_v25 = vadd.f32 %v3373_v4, %v4214_v9 }
 0x192   : > { %v1854_v21 = vadd.f32 %v4214_v9, %v1853_v8  ;;  %v3374_v13 = vpop.f32.mrb[34].mxu0  ;;  %v3438_v14 = vpop.f32.mrb[34].mxu1  ;;  %v1598_v16 = vadd.f32 %v4214_v9, %v1597_v7 }
 0x193   : > { %v1600_v17 = vpop.f32.mrb[35].mxu0  ;;  %v1856_v18 = vpop.f32.mrb[35].mxu1  ;;  %v2143_v23 = vadd.f32 %v2142_v10, %v2010_v6  ;;  %v2227_v24 = vadd.f32 %v2226_v11, %v2074_v61  ;;  %v2078_v31 = vmax.f32 %v1862_v12, 0.0  ;;  %v1609_v32 = vadd.f32 %v3374_v13, %v4214_v9 }
 0x194   : > { %v2076_v26 = vmax.f32 %v1854_v21, 0.0  ;;  %v1601_v27 = vadd.f32 %v4214_v9, %v1600_v17  ;;  %v1857_v28 = vadd.f32 %v4214_v9, %v1856_v18  ;;  %v2012_v33 = vmax.f32 %v1598_v16, 0.0 }
 0x195   : > { %v2144_v29 = vadd.f32 %v2143_v23, %v2011_v19  ;;  %v4292_v30 = vadd.f32 %v2227_v24, %v2075_v20  ;;  %v1865_v34 = vadd.f32 %v3438_v14, %v4214_v9  ;;  %v2014_v41 = vmax.f32 %v1606_v25, 0.0 }
 0x196   : > { %v2013_v35 = vmax.f32 %v1601_v27, 0.0  ;;  %v2077_v36 = vmax.f32 %v1857_v28, 0.0  ;;  %v2015_v51 = vmax.f32 %v1609_v32, 0.0  ;;  %v2128_v61 = vrot.slane %v2127_v40, 1 }
 0x197   : > { %v2145_v37 = vrot.slane %v2144_v29, 4  ;;  %v2079_v52 = vmax.f32 %v1865_v34, 0.0 }
 0x198   : > { %v3377_v38 = vpop.f32.mrb[36].mxu0  ;;  %v3441_v39 = vpop.f32.mrb[36].mxu1  ;;  %v2151_v42 = vadd.f32 %v2013_v35, %v2012_v33  ;;  %v2235_v43 = vadd.f32 %v2077_v36, %v2076_v26  ;;  %v2129_v14 = vadd.f32 %v2128_v61, %v2127_v40 }
 0x199   : > { %v1613_v44 = vpop.f32.mrb[37].mxu0  ;;  %v1869_v45 = vpop.f32.mrb[37].mxu1  ;;  %v2146_v46 = vadd.f32 %v2145_v37, %v2144_v29  ;;  %v1878_v58 = vadd.f32 %v3441_v39, %v4214_v9  ;;  %v1622_v1 = vadd.f32 %v3377_v38, %v4214_v9 }
 0x19a   : > { %v1614_v47 = vadd.f32 %v4214_v9, %v1613_v44  ;;  %v1870_v48 = vadd.f32 %v4214_v9, %v1869_v45  ;;  %v3378_v49 = vpop.f32.mrb[38].mxu0  ;;  %v3442_v50 = vpop.f32.mrb[38].mxu1  ;;  %v2152_v53 = vadd.f32 %v2151_v42, %v2014_v41  ;;  %v2236_v54 = vadd.f32 %v2235_v43, %v2078_v31 }
 0x19b   : > { %v1616_v55 = vpop.f32.mrb[39].mxu0  ;;  %v1872_v56 = vpop.f32.mrb[39].mxu1  ;;  %v2147_v57 = vrot.slane %v2146_v46, 2  ;;  %v1625_v6 = vadd.f32 %v3378_v49, %v4214_v9  ;;  %v1881_v7 = vadd.f32 %v3442_v50, %v4214_v9  ;;  %v2082_v10 = vmax.f32 %v1878_v58, 0.0 }
 0x19c   : > { %v2016_v59 = vmax.f32 %v1614_v47, 0.0  ;;  %v2080_v60 = vmax.f32 %v1870_v48, 0.0  ;;  %v2153_v62 = vadd.f32 %v2152_v53, %v2015_v51  ;;  %v2237_v63 = vadd.f32 %v2236_v54, %v2079_v52 }
 0x19d   : > { %v2148_v0 = vadd.f32 %v2147_v57, %v2146_v46  ;;  %v1617_v2 = vadd.f32 %v4214_v9, %v1616_v55  ;;  %v1873_v3 = vadd.f32 %v4214_v9, %v1872_v56  ;;  %v2018_v18 = vmax.f32 %v1622_v1, 0.0 }
 0x19e   : > { %v2154_v4 = vadd.f32 %v2153_v62, %v2016_v59  ;;  %v2238_v5 = vadd.f32 %v2237_v63, %v2080_v60  ;;  %v2019_v25 = vmax.f32 %v1625_v6, 0.0  ;;  %v2083_v26 = vmax.f32 %v1881_v7, 0.0 }
 0x19f   : > { %v2149_v8 = vrot.slane %v2148_v0, 1  ;;  %v2017_v11 = vmax.f32 %v1617_v2, 0.0  ;;  %v2081_v12 = vmax.f32 %v1873_v3, 0.0 }
 0x1a0   : > { %v3381_v21 = vpop.f32.mrb[40].mxu0  ;;  %v3445_v13 = vpop.f32.mrb[40].mxu1 }
 0x1a1   : > { %v1629_v15 = vpop.f32.mrb[41].mxu0  ;;  %v1885_v16 = vpop.f32.mrb[41].mxu1  ;;  %v2150_v17 = vadd.f32 %v2149_v8, %v2148_v0  ;;  %v2155_v19 = vadd.f32 %v2154_v4, %v2017_v11  ;;  %v2239_v20 = vadd.f32 %v2238_v5, %v2081_v12  ;;  %v1894_v35 = vadd.f32 %v3445_v13, %v4214_v9 }
 0x1a2   : > { %v3382_v23 = vpop.f32.mrb[42].mxu0  ;;  %v3446_v24 = vpop.f32.mrb[42].mxu1  ;;  %v1630_v27 = vadd.f32 %v4214_v9, %v1629_v15  ;;  %v1886_v28 = vadd.f32 %v4214_v9, %v1885_v16  ;;  %v1638_v36 = vadd.f32 %v3381_v21, %v4214_v9 }
 0x1a3   : > { %v1632_v29 = vpop.f32.mrb[43].mxu0  ;;  %v1888_v31 = vpop.f32.mrb[43].mxu1  ;;  %v4306_v32 = vsel %vm2285_vm0, %v2150_v17, %v2129_v14  ;;  %v2156_v33 = vadd.f32 %v2155_v19, %v2018_v18  ;;  %v2240_v34 = vadd.f32 %v2239_v20, %v2082_v10  ;;  %v1641_v43 = vadd.f32 %v3382_v23, %v4214_v9 }
 0x1a4   : > { %v2020_v37 = vmax.f32 %v1630_v27, 0.0  ;;  %v2084_v38 = vmax.f32 %v1886_v28, 0.0  ;;  %v1633_v39 = vadd.f32 %v4214_v9, %v1632_v29  ;;  %v1889_v42 = vadd.f32 %v4214_v9, %v1888_v31 }
 0x1a5   : > { %v2157_v40 = vadd.f32 %v2156_v33, %v2019_v25  ;;  %v2241_v41 = vadd.f32 %v2240_v34, %v2083_v26  ;;  %v1897_v44 = vadd.f32 %v3446_v24, %v4214_v9  ;;  %v2086_v46 = vmax.f32 %v1894_v35, 0.0 }
 0x1a6   : > { %v2021_v45 = vmax.f32 %v1633_v39, 0.0  ;;  %v2085_v49 = vmax.f32 %v1889_v42, 0.0  ;;  %v2022_v52 = vmax.f32 %v1638_v36, 0.0  ;;  %v2023_v61 = vmax.f32 %v1641_v43, 0.0 }
 0x1a7   : > { %v2158_v47 = vadd.f32 %v2157_v40, %v2020_v37  ;;  %v2242_v48 = vadd.f32 %v2241_v41, %v2084_v38  ;;  %v2087_v62 = vmax.f32 %v1897_v44, 0.0 }
 0x1a8   : > { %v3385_v50 = vpop.f32.mrb[44].mxu0  ;;  %v3449_v51 = vpop.f32.mrb[44].mxu1 }
 0x1a9   : > { %v1645_v53 = vpop.f32.mrb[45].mxu0  ;;  %v1901_v54 = vpop.f32.mrb[45].mxu1  ;;  %v2159_v55 = vadd.f32 %v2158_v47, %v2021_v45  ;;  %v2243_v56 = vadd.f32 %v2242_v48, %v2085_v49  ;;  %v1910_v63 = vadd.f32 %v3449_v51, %v4214_v9  ;;  %v1654_v6 = vadd.f32 %v3385_v50, %v4214_v9 }
 0x1aa   : > { %v1646_v57 = vadd.f32 %v4214_v9, %v1645_v53  ;;  %v1902_v58 = vadd.f32 %v4214_v9, %v1901_v54  ;;  %v3386_v59 = vpop.f32.mrb[46].mxu0  ;;  %v3450_v60 = vpop.f32.mrb[46].mxu1 }
 0x1ab   : > { %v1648_v0 = vpop.f32.mrb[47].mxu0  ;;  %v1904_v1 = vpop.f32.mrb[47].mxu1  ;;  %v2160_v2 = vadd.f32 %v2159_v55, %v2022_v52  ;;  %v2244_v3 = vadd.f32 %v2243_v56, %v2086_v46  ;;  %v2090_v12 = vmax.f32 %v1910_v63, 0.0  ;;  %v1657_v16 = vadd.f32 %v3386_v59, %v4214_v9 }
 0x1ac   : > { %v2024_v4 = vmax.f32 %v1646_v57, 0.0  ;;  %v2088_v5 = vmax.f32 %v1902_v58, 0.0  ;;  %v1649_v7 = vadd.f32 %v4214_v9, %v1648_v0  ;;  %v1905_v8 = vadd.f32 %v4214_v9, %v1904_v1 }
 0x1ad   : > { %v2161_v10 = vadd.f32 %v2160_v2, %v2023_v61  ;;  %v2245_v11 = vadd.f32 %v2244_v3, %v2087_v62  ;;  %v1913_v17 = vadd.f32 %v3450_v60, %v4214_v9  ;;  %v2026_v20 = vmax.f32 %v1654_v6, 0.0 }
 0x1ae   : > { %v2025_v21 = vmax.f32 %v1649_v7, 0.0  ;;  %v2089_v13 = vmax.f32 %v1905_v8, 0.0  ;;  %v2027_v36 = vmax.f32 %v1657_v16, 0.0 }
 0x1af   : > { %v2162_v14 = vadd.f32 %v2161_v10, %v2024_v4  ;;  %v2246_v15 = vadd.f32 %v2245_v11, %v2088_v5  ;;  %v2091_v37 = vmax.f32 %v1913_v17, 0.0 }
 0x1b0   : > { %v3389_v18 = vpop.f32.mrb[48].mxu0  ;;  %v3453_v19 = vpop.f32.mrb[48].mxu1 }
 0x1b1   : > { %v1661_v23 = vpop.f32.mrb[49].mxu0  ;;  %v1917_v24 = vpop.f32.mrb[49].mxu1  ;;  %v2163_v25 = vadd.f32 %v2162_v14, %v2025_v21  ;;  %v2247_v26 = vadd.f32 %v2246_v15, %v2089_v13  ;;  %v1926_v27 = vadd.f32 %v3453_v19, %v4214_v9  ;;  %v1670_v40 = vadd.f32 %v3389_v18, %v4214_v9 }
 0x1b2   : > { %v1918_v28 = vadd.f32 %v4214_v9, %v1917_v24  ;;  %v3390_v29 = vpop.f32.mrb[50].mxu0  ;;  %v3454_v31 = vpop.f32.mrb[50].mxu1  ;;  %v1662_v33 = vadd.f32 %v4214_v9, %v1661_v23 }
 0x1b3   : > { %v1664_v34 = vpop.f32.mrb[51].mxu0  ;;  %v1920_v35 = vpop.f32.mrb[51].mxu1  ;;  %v2164_v38 = vadd.f32 %v2163_v25, %v2026_v20  ;;  %v2248_v39 = vadd.f32 %v2247_v26, %v2090_v12  ;;  %v2094_v46 = vmax.f32 %v1926_v27, 0.0  ;;  %v1673_v47 = vadd.f32 %v3390_v29, %v4214_v9 }
 0x1b4   : > { %v2092_v41 = vmax.f32 %v1918_v28, 0.0  ;;  %v1665_v42 = vadd.f32 %v4214_v9, %v1664_v34  ;;  %v1921_v43 = vadd.f32 %v4214_v9, %v1920_v35  ;;  %v2028_v48 = vmax.f32 %v1662_v33, 0.0 }
 0x1b5   : > { %v2165_v44 = vadd.f32 %v2164_v38, %v2027_v36  ;;  %v4328_v45 = vadd.f32 %v2248_v39, %v2091_v37  ;;  %v1929_v49 = vadd.f32 %v3454_v31, %v4214_v9  ;;  %v2030_v55 = vmax.f32 %v1670_v40, 0.0 }
 0x1b6   : > { %v2029_v50 = vmax.f32 %v1665_v42, 0.0  ;;  %v2093_v51 = vmax.f32 %v1921_v43, 0.0  ;;  %v2031_v1 = vmax.f32 %v1673_v47, 0.0 }
 0x1b7   : > { %v2166_v52 = vrot.slane %v2165_v44, 4  ;;  %v2095_v2 = vmax.f32 %v1929_v49, 0.0 }
 0x1b8   : > { %v3393_v53 = vpop.f32.mrb[52].mxu0  ;;  %v3457_v54 = vpop.f32.mrb[52].mxu1  ;;  %v2172_v56 = vadd.f32 %v2029_v50, %v2028_v48  ;;  %v2256_v57 = vadd.f32 %v2093_v51, %v2092_v41 }
 0x1b9   : > { %v1677_v58 = vpop.f32.mrb[53].mxu0  ;;  %v1933_v59 = vpop.f32.mrb[53].mxu1  ;;  %v2167_v60 = vadd.f32 %v2166_v52, %v2165_v44  ;;  %v1942_v8 = vadd.f32 %v3457_v54, %v4214_v9  ;;  %v1686_v14 = vadd.f32 %v3393_v53, %v4214_v9 }
 0x1ba   : > { %v1678_v61 = vadd.f32 %v4214_v9, %v1677_v58  ;;  %v1934_v62 = vadd.f32 %v4214_v9, %v1933_v59  ;;  %v3394_v63 = vpop.f32.mrb[54].mxu0  ;;  %v3458_v0 = vpop.f32.mrb[54].mxu1  ;;  %v2173_v3 = vadd.f32 %v2172_v56, %v2030_v55  ;;  %v2257_v4 = vadd.f32 %v2256_v57, %v2094_v46 }
 0x1bb   : > { %v1680_v5 = vpop.f32.mrb[55].mxu0  ;;  %v1936_v6 = vpop.f32.mrb[55].mxu1  ;;  %v2168_v7 = vrot.slane %v2167_v60, 2  ;;  %v1689_v19 = vadd.f32 %v3394_v63, %v4214_v9  ;;  %v1945_v20 = vadd.f32 %v3458_v0, %v4214_v9  ;;  %v2098_v24 = vmax.f32 %v1942_v8, 0.0 }
 0x1bc   : > { %v2032_v10 = vmax.f32 %v1678_v61, 0.0  ;;  %v2096_v11 = vmax.f32 %v1934_v62, 0.0  ;;  %v2174_v12 = vadd.f32 %v2173_v3, %v2031_v1  ;;  %v2258_v21 = vadd.f32 %v2257_v4, %v2095_v2 }
 0x1bd   : > { %v2169_v13 = vadd.f32 %v2168_v7, %v2167_v60  ;;  %v1681_v15 = vadd.f32 %v4214_v9, %v1680_v5  ;;  %v1937_v16 = vadd.f32 %v4214_v9, %v1936_v6  ;;  %v2034_v34 = vmax.f32 %v1686_v14, 0.0 }
 0x1be   : > { %v2175_v17 = vadd.f32 %v2174_v12, %v2032_v10  ;;  %v2259_v18 = vadd.f32 %v2258_v21, %v2096_v11  ;;  %v2035_v39 = vmax.f32 %v1689_v19, 0.0  ;;  %v2099_v40 = vmax.f32 %v1945_v20, 0.0 }
 0x1bf   : > { %v2170_v23 = vrot.slane %v2169_v13, 1  ;;  %v2033_v25 = vmax.f32 %v1681_v15, 0.0  ;;  %v2097_v26 = vmax.f32 %v1937_v16, 0.0 }
 0x1c0   : > { %v3397_v27 = vpop.f32.mrb[56].mxu0  ;;  %v3461_v28 = vpop.f32.mrb[56].mxu1 }
 0x1c1   : > { %v1693_v29 = vpop.f32.mrb[57].mxu0  ;;  %v1949_v31 = vpop.f32.mrb[57].mxu1  ;;  %v2171_v33 = vadd.f32 %v2170_v23, %v2169_v13  ;;  %v2176_v35 = vadd.f32 %v2175_v17, %v2033_v25  ;;  %v2260_v36 = vadd.f32 %v2259_v18, %v2097_v26  ;;  %v1958_v49 = vadd.f32 %v3461_v28, %v4214_v9 }
 0x1c2   : > { %v3398_v37 = vpop.f32.mrb[58].mxu0  ;;  %v3462_v38 = vpop.f32.mrb[58].mxu1  ;;  %v1694_v41 = vadd.f32 %v4214_v9, %v1693_v29  ;;  %v1950_v42 = vadd.f32 %v4214_v9, %v1949_v31  ;;  %v1702_v50 = vadd.f32 %v3397_v27, %v4214_v9  ;;  %v2208_v23 = vrot.slane %v4254_v22, 4 }
 0x1c3   : > { %v1696_v43 = vpop.f32.mrb[59].mxu0  ;;  %v1952_v44 = vpop.f32.mrb[59].mxu1  ;;  %v4343_v46 = vsel %vm2287_vm1, %v2171_v33, %v4306_v32  ;;  %v2177_v47 = vadd.f32 %v2176_v35, %v2034_v34  ;;  %v2261_v48 = vadd.f32 %v2260_v36, %v2098_v24  ;;  %v1705_v57 = vadd.f32 %v3398_v37, %v4214_v9  ;;  %v3644_v35 = vld [vmem:[%s4631_s2] ss:$0 sm:$0xff] }
 0x1c4   : > { %v2036_v51 = vmax.f32 %v1694_v41, 0.0  ;;  %v2100_v52 = vmax.f32 %v1950_v42, 0.0  ;;  %v1697_v53 = vadd.f32 %v4214_v9, %v1696_v43  ;;  %v1953_v56 = vadd.f32 %v4214_v9, %v1952_v44 }
 0x1c5   : > { %v2178_v54 = vadd.f32 %v2177_v47, %v2035_v39  ;;  %v2262_v55 = vadd.f32 %v2261_v48, %v2099_v40  ;;  %v1961_v58 = vadd.f32 %v3462_v38, %v4214_v9  ;;  %v2102_v59 = vmax.f32 %v1958_v49, 0.0 }
 0x1c6   : > { %v2037_v32 = vmax.f32 %v1697_v53, 0.0  ;;  %v2101_v62 = vmax.f32 %v1953_v56, 0.0  ;;  %v2038_v1 = vmax.f32 %v1702_v50, 0.0  ;;  %v2039_v11 = vmax.f32 %v1705_v57, 0.0 }
 0x1c7   : > { %v2179_v60 = vadd.f32 %v2178_v54, %v2036_v51  ;;  %v2263_v61 = vadd.f32 %v2262_v55, %v2100_v52  ;;  %v2103_v12 = vmax.f32 %v1961_v58, 0.0  ;;  %v2229_v27 = vrot.slane %v4292_v30, 4 }
 0x1c8   : > { %v3401_v63 = vpop.f32.mrb[60].mxu0  ;;  %v3465_v0 = vpop.f32.mrb[60].mxu1  ;;  %v2250_v38 = vrot.slane %v4328_v45, 4  ;;  %v2209_v41 = vadd.f32 %v2208_v23, %v4254_v22  ;;  %v3655_v23 = vld [vmem:[%s4632_s3 + $0x20] ss:$16 sps:$4 sm:$0xff] (!%p3136_p4)  }
 0x1c9   : > { %v1709_v2 = vpop.f32.mrb[61].mxu0  ;;  %v1965_v3 = vpop.f32.mrb[61].mxu1  ;;  %v2180_v4 = vadd.f32 %v2179_v60, %v2037_v32  ;;  %v2264_v5 = vadd.f32 %v2263_v61, %v2101_v62  ;;  %v1974_v21 = vadd.f32 %v3465_v0, %v4214_v9  ;;  %v1718_v24 = vadd.f32 %v3401_v63, %v4214_v9 }
 0x1ca   : > { %v1710_v6 = vadd.f32 %v4214_v9, %v1709_v2  ;;  %v1966_v7 = vadd.f32 %v4214_v9, %v1965_v3  ;;  %v3402_v8 = vpop.f32.mrb[62].mxu0  ;;  %v3466_v10 = vpop.f32.mrb[62].mxu1  ;;  %v2230_v42 = vadd.f32 %v2229_v27, %v4292_v30  ;;  %v2251_v49 = vadd.f32 %v2250_v38, %v4328_v45  ;;  %v3661_v27 = vld [vmem:[%s4632_s3 + $0x40] ss:$16 sps:$4 sm:$0xff] (!%p3136_p4)   ;;  %v3674_v38 = vld [vmem:[%s4632_s3 + $0x88] ss:$16 sps:$4 sm:$0xff] (!%p3136_p4)  }
 0x1cb   : > { %v1712_v13 = vpop.f32.mrb[63].mxu0  ;;  %v1968_v14 = vpop.f32.mrb[63].mxu1  ;;  %v2181_v15 = vadd.f32 %v2180_v4, %v2038_v1  ;;  %v2265_v16 = vadd.f32 %v2264_v5, %v2102_v59  ;;  %v2106_v28 = vmax.f32 %v1974_v21, 0.0  ;;  %v1721_v36 = vadd.f32 %v3644_v35, %v3402_v8 }
 0x1cc   : > { %v2040_v17 = vmax.f32 %v1710_v6, 0.0  ;;  %v2104_v18 = vmax.f32 %v1966_v7, 0.0  ;;  %v1713_v19 = vadd.f32 %v4214_v9, %v1712_v13  ;;  %v1969_v20 = vadd.f32 %v4214_v9, %v1968_v14 }
 0x1cd   : > { %v2182_v25 = vadd.f32 %v2181_v15, %v2039_v11  ;;  %v2266_v26 = vadd.f32 %v2265_v16, %v2103_v12  ;;  %v1977_v37 = vadd.f32 %v3644_v35, %v3466_v10  ;;  %v2042_v39 = vmax.f32 %v1718_v24, 0.0  ;;  %v2108_v10 = vld [vmem:[#allocation2] sm:$0xff]  ;;  %v3656_v24 = vld [vmem:[%s4632_s3 + $0x28] ss:$16 sps:$4 sm:$0xff] (!%p3136_p4)  }
 0x1ce   : > { %v2041_v29 = vmax.f32 %v1713_v19, 0.0  ;;  %v2105_v31 = vmax.f32 %v1969_v20, 0.0  ;;  %v2043_v43 = vmax.f32 %v1721_v36, 0.0  ;;  %v2210_v52 = vrot.slane %v2209_v41, 2  ;;  %v3645_v15 = vld [vmem:[%s4632_s3 + $0x4] ss:$16 sps:$4 sm:$0xff] (!%p3136_p4)  }
 0x1cf   : > { %v2183_v33 = vadd.f32 %v2182_v25, %v2040_v17  ;;  %v2267_v34 = vadd.f32 %v2266_v26, %v2104_v18  ;;  %v2107_v44 = vmax.f32 %v1977_v37, 0.0  ;;  %v2231_v53 = vrot.slane %v2230_v42, 2  ;;  %2523 = vmatprep.subr.bf16.mxu0 (!%p3136_p4), %v3645_v15  ;;  %v3649_v17 = vld [vmem:[%s4632_s3] ss:$16 sps:$4 sm:$0xff] (!%p3136_p4)   ;;  %v3650_v18 = vld [vmem:[%s4632_s3 + $0x8] ss:$16 sps:$4 sm:$0xff] (!%p3136_p4)  }
 0x1d0   : > { %v2252_v56 = vrot.slane %v2251_v49, 2  ;;  %v2211_v32 = vadd.f32 %v2210_v52, %v2209_v41  ;;  %v3838_v16 = vmov (!%p3136_p4), 0   ;;  %v3651_v19 = vld [vmem:[%s4632_s3 + $0x24] ss:$16 sps:$4 sm:$0xff] (!%p3136_p4)   ;;  %2524 = vmatpush1.bf16.msra.mxu0 (!%p3136_p4), %v3649_v17  ;;  %v3653_v20 = vld [vmem:[%s4632_s3 + $0x2c] ss:$16 sps:$4 sm:$0xff] (!%p3136_p4)  }
 0x1d1   : > { %v2184_v40 = vadd.f32 %v2183_v33, %v2041_v29  ;;  %v2268_v9 = vadd.f32 %v2267_v34, %v2105_v31  ;;  %v2232_v59 = vadd.f32 %v2231_v53, %v2230_v42  ;;  %2555 = vmatprep.mubr.bf16.mxu0 (!%p3136_p4), %v3838_v16  ;;  %2596 = vmatprep.mubr.bf16.mxu1 (!%p3136_p4), %v3838_v16  ;;  %v3657_v25 = vld [vmem:[%s4632_s3 + $0x44] ss:$16 sps:$4 sm:$0xff] (!%p3136_p4)   ;;  %v3659_v26 = vld [vmem:[%s4632_s3 + $0x4c] ss:$16 sps:$4 sm:$0xff] (!%p3136_p4)   ;;  %v3667_v33 = vld [vmem:[%s4632_s3 + $0x60] ss:$16 sps:$4 sm:$0xff] (!%p3136_p4)  }
 0x1d2   : > { %v2253_v30 = vadd.f32 %v2252_v56, %v2251_v49  ;;  %v2212_v63 = vrot.slane %v2211_v32, 1  ;;  %2525 = vmatprep.subr.bf16.mxu0 (!%p3136_p4), %v3651_v19  ;;  %v3663_v29 = vld [vmem:[%s4632_s3 + $0x64] ss:$16 sps:$4 sm:$0xff] (!%p3136_p4)   ;;  %v3665_v31 = vld [vmem:[%s4632_s3 + $0x6c] ss:$16 sps:$4 sm:$0xff] (!%p3136_p4)  }
 0x1d3   : > { %v2185_v47 = vadd.f32 %v2184_v40, %v2042_v39  ;;  %v2269_v48 = vadd.f32 %v2268_v9, %v2106_v28  ;;  %v2233_v0 = vrot.slane %v2232_v59, 1  ;;  %v3662_v28 = vld [vmem:[%s4632_s3 + $0x48] ss:$16 sps:$4 sm:$0xff] (!%p3136_p4)   ;;  %v3669_v35 = vld [vmem:[%s4632_s3 + $0x84] ss:$16 sps:$4 sm:$0xff] (!%p3136_p4)  }
 0x1d4   : > { %v2254_v45 = vrot.slane %v2253_v30, 1  ;;  %v2213_v4 = vadd.f32 %v2212_v63, %v2211_v32  ;;  %2526 = vmatpush1.bf16.msra.mxu0 (!%p3136_p4), %v3655_v23  ;;  %v3668_v34 = vld [vmem:[%s4632_s3 + $0x68] ss:$16 sps:$4 sm:$0xff] (!%p3136_p4)   ;;  %v3671_v36 = vld [vmem:[%s4632_s3 + $0x8c] ss:$16 sps:$4 sm:$0xff] (!%p3136_p4)   ;;  %v3695_v56 = vld [vmem:[%s4634_s5] sm:$0xff] (!%p3136_p4)  }
 0x1d5   : > { %v2186_v50 = vadd.f32 %v2185_v47, %v2043_v43  ;;  %v2270_v51 = vadd.f32 %v2269_v48, %v2107_v44  ;;  %v2234_v5 = vadd.f32 %v2233_v0, %v2232_v59  ;;  %2527 = vmatprep.subr.bf16.mxu0 (!%p3136_p4), %v3657_v25  ;;  %v3673_v37 = vld [vmem:[%s4632_s3 + $0x80] ss:$16 sps:$4 sm:$0xff] (!%p3136_p4)   ;;  %v3675_v39 = vld [vmem:[%s4632_s3 + $0xa4] ss:$16 sps:$4 sm:$0xff] (!%p3136_p4)   ;;  %v3677_v40 = vld [vmem:[%s4632_s3 + $0xac] ss:$16 sps:$4 sm:$0xff] (!%p3136_p4)  }
 0x1d6   : > { %v2255_v7 = vadd.f32 %v2254_v45, %v2253_v30  ;;  %v3679_v9 = vld [vmem:[%s4632_s3 + $0xa0] ss:$16 sps:$4 sm:$0xff] (!%p3136_p4)   ;;  %v3680_v41 = vld [vmem:[%s4632_s3 + $0xa8] ss:$16 sps:$4 sm:$0xff] (!%p3136_p4)   ;;  %v3681_v42 = vld [vmem:[%s4632_s3 + $0xc4] ss:$16 sps:$4 sm:$0xff] (!%p3136_p4)  }
 0x1d7   : > { %v2187_v54 = vrot.slane %v2186_v50, 4  ;;  %v2271_v55 = vrot.slane %v2270_v51, 4  ;;  %v3683_v43 = vld [vmem:[%s4632_s3 + $0xcc] ss:$16 sps:$4 sm:$0xff] (!%p3136_p4)   ;;  %v3685_v44 = vld [vmem:[%s4632_s3 + $0xc0] ss:$16 sps:$4 sm:$0xff] (!%p3136_p4)  }
 0x1d8   : > { %2528 = vmatpush1.bf16.msra.mxu0 (!%p3136_p4), %v3661_v27  ;;  %v3686_v47 = vld [vmem:[%s4632_s3 + $0xc8] ss:$16 sps:$4 sm:$0xff] (!%p3136_p4)   ;;  %v3687_v48 = vld [vmem:[%s4632_s3 + $0xe4] ss:$16 sps:$4 sm:$0xff] (!%p3136_p4)  }
 0x1d9   : > { %v2188_v57 = vadd.f32 %v2187_v54, %v2186_v50  ;;  %v2272_v58 = vadd.f32 %v2271_v55, %v2270_v51  ;;  %2529 = vmatprep.subr.bf16.mxu0 (!%p3136_p4), %v3663_v29  ;;  %v3689_v50 = vld [vmem:[%s4632_s3 + $0xec] ss:$16 sps:$4 sm:$0xff] (!%p3136_p4)   ;;  %v3691_v51 = vld [vmem:[%s4632_s3 + $0xe0] ss:$16 sps:$4 sm:$0xff] (!%p3136_p4)   ;;  %v3692_v52 = vld [vmem:[%s4632_s3 + $0xe8] ss:$16 sps:$4 sm:$0xff] (!%p3136_p4)  }
 0x1da   : > { %v3693_v54 = vld [vmem:[%s4634_s5 + $0x40] sm:$0xff] (!%p3136_p4)   ;;  %v3697_v32 = vld [vmem:[%s4634_s5 + $0x48] sm:$0xff] (!%p3136_p4)   ;;  %v3701_v30 = vld [vmem:[%s4634_s5 + $0x50] sm:$0xff] (!%p3136_p4)  }
 0x1db   : > { %v2189_v22 = vrot.slane %v2188_v57, 2  ;;  %v2273_v60 = vrot.slane %v2272_v58, 2  ;;  %v3694_v55 = vld [vmem:[%s4634_s5 + $0xc0] sm:$0xff] (!%p3136_p4)   ;;  %v3698_v59 = vld [vmem:[%s4634_s5 + $0xc8] sm:$0xff] (!%p3136_p4)   ;;  %v3704_v63 = vld [vmem:[%s4634_s5 + $0x90] sm:$0xff] (!%p3136_p4)  }
 0x1dc   : > { %2530 = vmatpush1.bf16.msra.mxu0 (!%p3136_p4), %v3667_v33  ;;  %v3705_v0 = vld [vmem:[%s4634_s5 + $0x58] sm:$0xff] (!%p3136_p4)  }
 0x1dd   : > { %v2190_v61 = vadd.f32 %v2189_v22, %v2188_v57  ;;  %v2274_v62 = vadd.f32 %v2273_v60, %v2272_v58  ;;  %2531 = vmatprep.subr.bf16.mxu0 (!%p3136_p4), %v3669_v35  ;;  %v3696_v58 = vld [vmem:[%s4634_s5 + $0x80] sm:$0xff] (!%p3136_p4)   ;;  %v3699_v22 = vld [vmem:[%s4634_s5 + $0x8] sm:$0xff] (!%p3136_p4)   ;;  %v3707_v45 = vld [vmem:[%s4634_s5 + $0x18] sm:$0xff] (!%p3136_p4)  }
 0x1de   : > { %v3700_v60 = vld [vmem:[%s4634_s5 + $0x88] sm:$0xff] (!%p3136_p4)   ;;  %v3721_v15 = vld [vmem:[%s4634_s5 + $0x78] sm:$0xff] (!%p3136_p4)  }
 0x1df   : > { %v2191_v1 = vrot.slane %v2190_v61, 1  ;;  %v2275_v3 = vrot.slane %v2274_v62, 1  ;;  %v3723_v16 = vld [vmem:[%s4634_s5 + $0x38] sm:$0xff] (!%p3136_p4)  }
 0x1e0   : > { %2532 = vmatpush1.bf16.msra.mxu0 (!%p3136_p4), %v3673_v37  ;;  %v3724_v17 = vld [vmem:[%s4634_s5 + $0xb8] sm:$0xff] (!%p3136_p4)  }
 0x1e1   : > { %v2192_v2 = vadd.f32 %v2191_v1, %v2190_v61  ;;  %v2276_v11 = vadd.f32 %v2275_v3, %v2274_v62  ;;  %2533 = vmatprep.subr.bf16.mxu0 (!%p3136_p4), %v3675_v39  ;;  %v3702_v61 = vld [vmem:[%s4634_s5 + $0xd0] sm:$0xff] (!%p3136_p4)   ;;  %v3706_v1 = vld [vmem:[%s4634_s5 + $0xd8] sm:$0xff] (!%p3136_p4)   ;;  %v3709_v3 = vld [vmem:[%s4634_s5 + $0x60] sm:$0xff] (!%p3136_p4)  }
 0x1e2   : > { %v3703_v62 = vld [vmem:[%s4634_s5 + $0x10] sm:$0xff] (!%p3136_p4)  }
 0x1e3   : > { %v2290_v6 = vsel %vm2289_vm2, %v2192_v2, %v4343_v46  ;;  %v3647_v46 = vld [vmem:[%s4632_s3 + $0xc] ss:$16 sps:$4 sm:$0xff] (!%p3136_p4)  }
 0x1e4   : > { %v2292_v8 = vsel %vm2291_vm3, %v2213_v4, %v2290_v6  ;;  %2305 = sbr.rel (%p3136_p4) target bundleno = 954 (0x3ba), region = 97  ;;  %2564 = vmatprep.subr.bf16.mxu1 (!%p3136_p4), %v3647_v46  ;;  %2534 = vmatpush1.bf16.msra.mxu0 (!%p3136_p4), %v3679_v9  ;;  %v3708_v2 = vld [vmem:[%s4634_s5 + $0x98] sm:$0xff] (!%p3136_p4)   ;;  %v3710_v4 = vld [vmem:[%s4634_s5 + $0xe0] sm:$0xff] (!%p3136_p4)  }
 0x1e5   : > { %v2294_v12 = vsel %vm2293_vm4, %v2234_v5, %v2292_v8  ;;  %2565 = vmatpush1.bf16.msra.mxu1 (!%p3136_p4), %v3650_v18  ;;  %2535 = vmatprep.subr.bf16.mxu0 (!%p3136_p4), %v3681_v42  ;;  %v3711_v5 = vld [vmem:[%s4634_s5 + $0x20] sm:$0xff] (!%p3136_p4)   ;;  %v3714_v8 = vld [vmem:[%s4634_s5 + $0xe8] sm:$0xff] (!%p3136_p4)   ;;  %v3722_v46 = vld [vmem:[%s4634_s5 + $0xf8] sm:$0xff] (!%p3136_p4)   ;;  %v2343_v18 = vlaneseq (!%p3136_p4) }
 0x1e6   : > { %v2296_v21 = vsel %vm2295_vm5, %v2255_v7, %v2294_v12  ;;  %2566 = vmatprep.subr.bf16.mxu1 (!%p3136_p4), %v3653_v20  ;;  %v3712_v6 = vld [vmem:[%s4634_s5 + $0xa0] sm:$0xff] (!%p3136_p4)   ;;  %v3713_v7 = vld [vmem:[%s4634_s5 + $0x68] sm:$0xff] (!%p3136_p4)   ;;  %v3717_v12 = vld [vmem:[%s4634_s5 + $0x70] sm:$0xff] (!%p3136_p4)  }
 0x1e7   : > { %v2298_v13 = vsel %vm2297_vm6, %v2276_v11, %v2296_v21  ;;  %v3716_v11 = vld [vmem:[%s4634_s5 + $0xa8] sm:$0xff] (!%p3136_p4)   ;;  %v3718_v21 = vld [vmem:[%s4634_s5 + $0xf0] sm:$0xff] (!%p3136_p4)   ;;  %v2344_v19 = vshrl.u32 (!%p3136_p4), %v2343_v18, 7 }
 0x1e8   : > { %v2300_v14 = vadd.f32 %v2298_v13, %v2108_v10  ;;  %2536 = vmatpush1.bf16.msra.mxu0 (!%p3136_p4), %v3685_v44  ;;  %v3715_v10 = vld [vmem:[%s4634_s5 + $0x28] sm:$0xff] (!%p3136_p4)   ;;  %v3719_v13 = vld [vmem:[%s4634_s5 + $0x30] sm:$0xff] (!%p3136_p4)  }
 0x1e9   : > { %2567 = vmatpush1.bf16.msra.mxu1 (!%p3136_p4), %v3656_v24  ;;  %2537 = vmatprep.subr.bf16.mxu0 (!%p3136_p4), %v3687_v48  ;;  %v2345_v20 = vsub.s32 (!%p3136_p4), 0, %v2344_v19  ;;  %v2353_v23 = vsub.s32 (!%p3136_p4), 2, %v2344_v19  ;;  %v2341_v24 = vld [vmem:[%s4633_s4] sm:$0xf] (!%p3136_p4)  ;;  %v2349_v25 = vsub.s32 (!%p3136_p4), 1, %v2344_v19 }
 0x1ea   : > { %2301 = vst [vmem:[#allocation2] sm:$0xff] %v2300_v14  ;;  %2568 = vmatprep.subr.bf16.mxu1 (!%p3136_p4), %v3659_v26  ;;  %v3720_v14 = vld [vmem:[%s4634_s5 + $0xb0] sm:$0xff] (!%p3136_p4)   ;;  %v2357_v26 = vsub.s32 (!%p3136_p4), 3, %v2344_v19 }
 0x1eb   : > { %v2346_v27 = vrot.slane %v2341_v24, %v2345_v20  ;;  %v2350_v29 = vrot.slane %v2341_v24, %v2349_v25 }
 0x1ec   : > { %2538 = vmatpush1.bf16.msra.mxu0 %v3691_v51 }
 0x1ed   : > { %2569 = vmatpush1.bf16.msra.mxu1 %v3662_v28  ;;  %3279 = vmatprep.subr.bf16.mxu0 %v3693_v54  ;;  %v2354_v28 = vrot.slane %v2341_v24, %v2353_v23 }
 0x1ee   : > { %2570 = vmatprep.subr.bf16.mxu1 %v3665_v31  ;;  %v2358_v31 = vrot.slane %v2341_v24, %v2357_v26 }
 0x1f1   : > { %2571 = vmatpush1.bf16.msra.mxu1 %v3668_v34  ;;  %v2306_v49 = vld [vmem:[#allocation2] sm:$0xff] }
 0x1f2   : > { %2572 = vmatprep.subr.bf16.mxu1 %v3671_v36  ;;  %v2307_v53 = vmul.f32 0.00390625, %v2306_v49 }
 0x1f4   : > { %v2308_v57 = vpack.c.bf16 %v2307_v53, %v2307_v53 }
 0x1f5   : > { %2573 = vmatpush1.bf16.msra.mxu1 %v3674_v38 }
 0x1f6   : > { %2574 = vmatprep.subr.bf16.mxu1 %v3677_v40  ;;  %2556 = vmatmul.mubr.bf16.vlgmr.msra.gmra.mrb[0].mxu0 %v2308_v57 }
 0x1f7   : > { %3280 = vmatpush3.bf16.msra.mxu0 %v3695_v56  ;;  %v3169_v56 = vld [vmem:[%s4635_s6] ss:$0 sm:$0xff] }
 0x1f8   : > { %3281 = vmatprep.subr.bf16.mxu0 %v3697_v32 }
 0x1f9   : > { %2575 = vmatpush1.bf16.msra.mxu1 %v3680_v41 }
 0x1fa   : > { %2576 = vmatprep.subr.bf16.mxu1 %v3683_v43 }
 0x1fb   : > { %3282 = vmatpush3.bf16.msra.mxu0 %v3699_v22 }
 0x1fc   : > { %3283 = vmatprep.subr.bf16.mxu0 %v3701_v30 }
 0x1fd   : > { %2577 = vmatpush1.bf16.msra.mxu1 %v3686_v47 }
 0x1fe   : > { %2578 = vmatprep.subr.bf16.mxu1 %v3689_v50 }
 0x1ff   : > { %3284 = vmatpush3.bf16.msra.mxu0 %v3703_v62 }
 0x200   : > { %3285 = vmatprep.subr.bf16.mxu0 %v3705_v0 }
 0x201   : > { %2579 = vmatpush1.bf16.msra.mxu1 %v3692_v52 }
 0x202   : > { %3301 = vmatprep.subr.bf16.mxu1 %v3694_v55 }
 0x203   : > { %3286 = vmatpush3.bf16.msra.mxu0 %v3707_v45 }
 0x204   : > { %2597 = vmatmul.mubr.bf16.vlgmr.msra.gmra.mrb[0].mxu1 %v2308_v57  ;;  %3287 = vmatprep.subr.bf16.mxu0 %v3709_v3 }
 0x205   : > { %3302 = vmatpush3.bf16.msra.mxu1 %v3696_v58 }
 0x206   : > { %3303 = vmatprep.subr.bf16.mxu1 %v3698_v59 }
 0x207   : > { %3288 = vmatpush3.bf16.msra.mxu0 %v3711_v5 }
 0x208   : > { %3289 = vmatprep.subr.bf16.mxu0 %v3713_v7 }
 0x209   : > { %3304 = vmatpush3.bf16.msra.mxu1 %v3700_v60 }
 0x20a   : > { %3305 = vmatprep.subr.bf16.mxu1 %v3702_v61 }
 0x20b   : > { %3290 = vmatpush3.bf16.msra.mxu0 %v3715_v10 }
 0x20c   : > { %3291 = vmatprep.subr.bf16.mxu0 %v3717_v12 }
 0x20d   : > { %3306 = vmatpush3.bf16.msra.mxu1 %v3704_v63 }
 0x20e   : > { %3307 = vmatprep.subr.bf16.mxu1 %v3706_v1 }
 0x20f   : > { %3292 = vmatpush3.bf16.msra.mxu0 %v3719_v13 }
 0x210   : > { %3293 = vmatprep.subr.bf16.mxu0 %v3721_v15 }
 0x211   : > { %3308 = vmatpush3.bf16.msra.mxu1 %v3708_v2 }
 0x212   : > { %3309 = vmatprep.subr.bf16.mxu1 %v3710_v4 }
 0x213   : > { %3294 = vmatpush3.bf16.msra.mxu0 %v3723_v16 }
 0x215   : > { %3310 = vmatpush3.bf16.msra.mxu1 %v3712_v6 }
 0x216   : > { %3311 = vmatprep.subr.bf16.mxu1 %v3714_v8 }
 0x219   : > { %3312 = vmatpush3.bf16.msra.mxu1 %v3716_v11 }
 0x21a   : > { %3313 = vmatprep.subr.bf16.mxu1 %v3718_v21 }
 0x21d   : > { %3314 = vmatpush3.bf16.msra.mxu1 %v3720_v14 }
 0x21e   : > { %3315 = vmatprep.subr.bf16.mxu1 %v3722_v46 }
 0x221   : > { %3316 = vmatpush3.bf16.msra.mxu1 %v3724_v17 }
 0x2c9   : > { %v2557_v33 = vpop.f32.mrb[0].mxu0 }
 0x2ca   : > { %v2558_v35 = vadd.f32 %v2557_v33, %v2346_v27  ;;  %v2559_v37 = vpop.f32.mrb[1].mxu0 }
 0x2cb   : > { %v2560_v39 = vadd.f32 %v2559_v37, %v2350_v29  ;;  %v2561_v9 = vpop.f32.mrb[2].mxu0 }
 0x2cc   : > { %v2605_v42 = vmax.f32 %v2558_v35, 0.0  ;;  %v2562_v44 = vpop.f32.mrb[3].mxu0 }
 0x2cd   : > { %v2606_v48 = vmax.f32 %v2560_v39, 0.0 }
 0x2ce   : > { %v2609_v53 = vpack.c.bf16 %v2605_v42, %v2605_v42 }
 0x2cf   : > { %v2610_v51 = vpack.c.bf16 %v2606_v48, %v2606_v48 }
 0x2d1   : > { %2908 = vmatprep.mubr.bf16.mxu0 %v2610_v51 }
 0x2d2   : > { %2909 = vmatmul.mubr.bf16.vlgmr.msra.gmra.mrb[4].mxu0 %v2609_v53 }
 0x2d7   : > { %v2598_v34 = vpop.f32.mrb[0].mxu1 }
 0x2d8   : > { %v2599_v36 = vadd.f32 %v2598_v34, %v2354_v28  ;;  %v2600_v38 = vpop.f32.mrb[1].mxu1 }
 0x2d9   : > { %v2601_v40 = vadd.f32 %v2600_v38, %v2358_v31  ;;  %v2602_v41 = vpop.f32.mrb[2].mxu1 }
 0x2da   : > { %v2607_v43 = vmax.f32 %v2599_v36, 0.0  ;;  %v2603_v47 = vpop.f32.mrb[3].mxu1 }
 0x2db   : > { %v2608_v49 = vmax.f32 %v2601_v40, 0.0 }
 0x2dc   : > { %v2611_v50 = vpack.c.bf16 %v2607_v43, %v2607_v43 }
 0x2dd   : > { %v2612_v52 = vpack.c.bf16 %v2608_v49, %v2608_v49 }
 0x2df   : > { %2948 = vmatprep.mubr.bf16.mxu1 %v2612_v52 }
 0x2e0   : > { %2949 = vmatmul.mubr.bf16.vlgmr.msra.gmra.mrb[4].mxu1 %v2611_v50 }
 0x3a5   : > { %v3295_v54 = vpop.f32.mrb[4].mxu0 }
 0x3a6   : > { %v3296_v57 = vpop.f32.mrb[5].mxu0 }
 0x3a7   : > { %v3297_v32 = vadd.f32 %v3296_v57, %v3295_v54  ;;  %v3298_v22 = vpop.f32.mrb[6].mxu0 }
 0x3a8   : > { %v3299_v30 = vpop.f32.mrb[7].mxu0 }
 0x3a9   : > { %v2911_v62 = vadd.f32 %v3297_v32, %v3169_v56 }
 0x3b3   : > { %v3317_v55 = vpop.f32.mrb[4].mxu1 }
 0x3b4   : > { %v3318_v58 = vpop.f32.mrb[5].mxu1 }
 0x3b5   : > { %v3319_v59 = vadd.f32 %v3318_v58, %v3317_v55  ;;  %v3320_v60 = vpop.f32.mrb[6].mxu1 }
 0x3b6   : > { %v3321_v61 = vpop.f32.mrb[7].mxu1 }
 0x3b7   : > { %v2951_v63 = vadd.f32 %v3319_v59, %v2911_v62 }
 0x3b9   : > { %2956 = vst [vmem:[%s4649_s16] sm:$0xff] %v2951_v63 }
 0x3ba PF: > { %s3203_s17 = sshll.u32 %s3823_s30, 7  ;;  %s4650_s20 = scalar_lea.vmem [#allocation4], %s4117_s12 }
 0x3bb   : > { %s4572_s0 = scalar_lea.hbm %s4636_s7, %s3203_s17  ;;  %s2971_s22 = sshll.u32 %s4650_s20, 4  ;;  %s2972_s22 = int_to_ptr.vmem [resolvable:$true] %s2971_s22 }
 0x3bc   : > { %s4651_s21 = sand.u32 1, %s3803_s25   ;;  %s3725_s18 = scalar_lea.vmem %s2972_s22, 128 }
 0x3bd   : > { %s2958_s14 = scalar_lea.sflag [#allocation5], %s4651_s21  ;;  %p3726_p5 = scmp.ne.s32.totalorder %s2972_s22, %s3725_s18 }
 0x3be   : > { %s3839_s27 = smov [#allocation4]  }
 0x3bf   : > { %p3727_p6 = pnand %p3726_p5, %p3952_p7  ;;  %s3729_s15 = sshll.u32 %s3839_s27, 4  ;;  %s3730_s15 = int_to_ptr.vmem [resolvable:$false] %s3729_s15 }
 0x3c0   : > { %s3731_s16 = scalar_lea.vmem %s3730_s15, 256  ;;  %p3732_p9 = scmp.lt.s32.totalorder %s2972_s22, %s3730_s15 }
 0x3c1   : > { %p3728_p8 = pneg %p3727_p6  ;;  %p3733_p10 = scmp.lt.s32.totalorder %s3731_s16, %s3725_s18 }
 0x3c3   : > { %p3734_p11 = por %p3733_p10, %p3732_p9 }
 0x3c5   : > { %p3735_p13 = pnand %p3734_p11, %p3728_p8 }
 0x3c7   : > { %3738 = shalt.err (!%p3735_p13)
}
 0x3c8   : > { %s3739_s30 = scalar_lea.hbm %s4572_s0, 128  ;;  %s3743_s29 = scalar_lea.hbm %s4636_s7, 256 }
 0x3c9   : > { %p3740_p0 = scmp.ne.s32.totalorder %s4572_s0, %s3739_s30  ;;  %p3744_p3 = scmp.lt.u32.totalorder %s4572_s0, %s4636_s7 }
 0x3ca   : > { %p3745_p4 = scmp.lt.u32.totalorder %s3743_s29, %s3739_s30  ;;  %p3747_p6 = scmp.lt.u32.totalorder %s3739_s30, %s4572_s0 }
 0x3cb   : > { %p3741_p1 = pnand %p3740_p0, %p3952_p7 }
 0x3cc   : > { %p3746_p5 = por %p3745_p4, %p3744_p3 }
 0x3cd   : > { %p3742_p2 = pneg %p3741_p1 }
 0x3ce   : > { %p3748_p8 = por %p3747_p6, %p3746_p5 }
 0x3d0   : > { %p3749_p9 = pnand %p3748_p8, %p3742_p2 }
 0x3d2   : > { %3752 = shalt.err (!%p3749_p9)
}
 0x3d3   : > { %3483 = dma.vmem_to_hbm [thread:$0]  (%p3952_p7), %s2972_s22, 128, %s4572_s0, %s2958_s14  }
 0x3d4 PF: > { %p3489_p10 = scmp.ge.s32.totalorder %s3835_s10, 2  ;;  %s2983_s18 = sand.u32 1, %s3799_s24  }
 0x3d5   : > { %s2984_s27 = scalar_lea.sflag [#allocation5], %s2983_s18 }
 0x3d6   : > { %p3486_p11 = pnand %p3489_p10, %p3960_p12 }
 0x3d8   : > { %3794 = dma.done.wait (!%p3486_p11), %s2984_s27, 128  }
 0x3d9   : > { %3796 = vsyncadd (!%p3486_p11), %s2984_s27, 4294967168  ;;  %s20_s10 = sadd.s32 1, %s3835_s10   ;;  %s4653_s19 = sld [smem:[#allocation7_spill]] }
 0x3da   : > { %p17_p13 = scmp.ge.s32.totalorder %s20_s10, 6   ;;  %s4654_s0 = sld [smem:[#allocation8_spill]] }
 0x3db   : > { %s4655_s24 = smov %s3803_s25  ;;  %s4656_s25 = smov %s3807_s26 }
 0x3dc   : > { %s4657_s26 = smov %s3965_s23  ;;  %s4658_s27 = smov %s3815_s28 }
 0x3dd   : > { %s4659_s28 = smov %s3968_s11  ;;  %s4660_s29 = smov %s3827_s8 }
 0x3de   : > { %s4661_s30 = smov %s3831_s9  ;;  %19 = sbr.rel (!%p17_p13) target bundleno = 8 (0x8), region = 137 }
 0x3df   : > { %s4662_s8 = smov %s4653_s19 }
 0x3e0   : > { %s4663_s9 = smov %s4654_s0 }
 0x3e5   :  { %2989 = vsyncpa [#allocation5], 1 }
 0x3e6   :  { %2991 = vsyncpa [#allocation5 + $0x1], 1 }

</bundles_post_ra>
